<compile_context>
chip_gen: v6e
topology: v6e:2x2x1
jax: 0.10.0
libtpu: 0.0.40
codegen_flags: <defaults>
</compile_context>

<pallas_src>
import math

import jax
import jax.numpy as jnp
from jax import lax
from jax.experimental import pallas as pl
from jax.experimental.pallas import tpu as pltpu


# ----------------------------- Pallas kernels -----------------------------

def conv_gemm_bn_relu_kernel(a_ref, b_ref, scale_ref, shift_ref, o_ref):
    # conv-as-GEMM with fused eval-mode BatchNorm (scale/shift) + ReLU epilogue.
    acc = jnp.dot(a_ref[...], b_ref[...], preferred_element_type=jnp.float32)
    o_ref[...] = jnp.maximum(acc * scale_ref[...] + shift_ref[...],
                             0.0).astype(o_ref.dtype)


def conv_gemm_add_kernel(a_ref, b_ref, res_ref, o_ref):
    # conv-as-GEMM with the residual add fused into the epilogue.
    acc = jnp.dot(a_ref[...], b_ref[...], preferred_element_type=jnp.float32)
    o_ref[...] = (acc + res_ref[...].astype(jnp.float32)).astype(o_ref.dtype)


def conv_gemm_kernel(a_ref, b_ref, o_ref):
    # plain conv-as-GEMM (1x1 projection shortcut).
    o_ref[...] = jnp.dot(a_ref[...], b_ref[...],
                         preferred_element_type=jnp.float32).astype(o_ref.dtype)


def bn_relu_kernel(x_ref, scale_ref, shift_ref, o_ref):
    # fused eval-mode BatchNorm + ReLU (epilogue math in f32).
    x = x_ref[...].astype(jnp.float32)
    o_ref[...] = jnp.maximum(x * scale_ref[...] + shift_ref[...],
                             0.0).astype(o_ref.dtype)


# ----------------------------- helpers -----------------------------

def _round_up(x, m):
    return ((x + m - 1) // m) * m


def _choose_tm(m):
    """Largest power-of-two row tile <= 256 that divides m and gives >=2 grid
    blocks (so both v7x TensorCores get work); falls back to a single block."""
    for tm in (256, 128, 64, 32, 16, 8):
        if m % tm == 0 and m // tm >= 2:
            return tm
    return m


def _prep_rows(arrs, m):
    """Pad the row dim of each array up to a multiple of 8 if needed."""
    m_pad = _round_up(m, 8)
    if m_pad != m:
        arrs = [jnp.pad(a, ((0, m_pad - m), (0, 0))) for a in arrs]
    return arrs, m_pad


def im2col(x, kh, kw, stride, pad):
    """x: (N, H, W, C) -> (N*Ho*Wo, kh*kw*C) with (kh, kw, C)-minor ordering."""
    n, h, w, c = x.shape
    xp = jnp.pad(x, ((0, 0), (pad, pad), (pad, pad), (0, 0)))
    ho = (h + 2 * pad - kh) // stride + 1
    wo = (w + 2 * pad - kw) // stride + 1
    cols = []
    for i in range(kh):
        for j in range(kw):
            cols.append(xp[:, i:i + stride * ho:stride,
                           j:j + stride * wo:stride, :])
    patches = jnp.stack(cols, axis=3)              # (N, Ho, Wo, kh*kw, C)
    return patches.reshape(n * ho * wo, kh * kw * c), ho, wo
# TODO(synk): for non-toy batch sizes, move patch extraction into the kernel
# (shifted-window accumulation over 9 jnp.dot calls) to cut conv input HBM
# traffic ~9x instead of materializing im2col patches.


# ----------------------------- Pallas wrappers -----------------------------

def conv_gemm_bn_relu(a, b, scale, shift, out_dtype=jnp.bfloat16):
    m, k = a.shape
    _, nc = b.shape
    (a,), m_pad = _prep_rows([a], m)
    tm = _choose_tm(m_pad)
    out = pl.pallas_call(
        conv_gemm_bn_relu_kernel,
        out_shape=jax.ShapeDtypeStruct((m_pad, nc), out_dtype),
        grid=(m_pad // tm,),
        in_specs=[
            pl.BlockSpec((tm, k), lambda i: (i, 0)),
            pl.BlockSpec((k, nc), lambda i: (0, 0)),
            pl.BlockSpec((1, nc), lambda i: (0, 0)),
            pl.BlockSpec((1, nc), lambda i: (0, 0)),
        ],
        out_specs=pl.BlockSpec((tm, nc), lambda i: (i, 0)),
        compiler_params=pltpu.CompilerParams(
            dimension_semantics=("parallel",)),
    )(a, b, scale, shift)
    return out[:m] if m_pad != m else out


def conv_gemm_add(a, b, res, out_dtype=jnp.float32):
    m, k = a.shape
    _, nc = b.shape
    (a, res), m_pad = _prep_rows([a, res], m)
    tm = _choose_tm(m_pad)
    out = pl.pallas_call(
        conv_gemm_add_kernel,
        out_shape=jax.ShapeDtypeStruct((m_pad, nc), out_dtype),
        grid=(m_pad // tm,),
        in_specs=[
            pl.BlockSpec((tm, k), lambda i: (i, 0)),
            pl.BlockSpec((k, nc), lambda i: (0, 0)),
            pl.BlockSpec((tm, nc), lambda i: (i, 0)),
        ],
        out_specs=pl.BlockSpec((tm, nc), lambda i: (i, 0)),
        compiler_params=pltpu.CompilerParams(
            dimension_semantics=("parallel",)),
    )(a, b, res)
    return out[:m] if m_pad != m else out


def conv_gemm(a, b, out_dtype=jnp.float32):
    m, k = a.shape
    _, nc = b.shape
    (a,), m_pad = _prep_rows([a], m)
    tm = _choose_tm(m_pad)
    out = pl.pallas_call(
        conv_gemm_kernel,
        out_shape=jax.ShapeDtypeStruct((m_pad, nc), out_dtype),
        grid=(m_pad // tm,),
        in_specs=[
            pl.BlockSpec((tm, k), lambda i: (i, 0)),
            pl.BlockSpec((k, nc), lambda i: (0, 0)),
        ],
        out_specs=pl.BlockSpec((tm, nc), lambda i: (i, 0)),
        compiler_params=pltpu.CompilerParams(
            dimension_semantics=("parallel",)),
    )(a, b)
    return out[:m] if m_pad != m else out


def bn_relu(x, scale, shift, out_dtype=jnp.bfloat16):
    """Eval-mode BN folded into scale/shift, fused with ReLU; row-tiled grid."""
    n, h, w, c = x.shape
    m = n * h * w
    x2 = x.reshape(m, c)
    (x2,), m_pad = _prep_rows([x2], m)
    tm = _choose_tm(m_pad)
    out = pl.pallas_call(
        bn_relu_kernel,
        out_shape=jax.ShapeDtypeStruct((m_pad, c), out_dtype),
        grid=(m_pad // tm,),
        in_specs=[
            pl.BlockSpec((tm, c), lambda i: (i, 0)),
            pl.BlockSpec((1, c), lambda i: (0, 0)),
            pl.BlockSpec((1, c), lambda i: (0, 0)),
        ],
        out_specs=pl.BlockSpec((tm, c), lambda i: (i, 0)),
        compiler_params=pltpu.CompilerParams(
            dimension_semantics=("parallel",)),
    )(x2, scale, shift)
    out = out[:m] if m_pad != m else out
    return out.reshape(n, h, w, c)


# ----------------------------- BasicBlock forward -----------------------------

def basic_block_forward(params, x_nchw, *, stride, equal_in_out, out_planes):
    """Matches BasicBlock.forward (eval mode; dropRate dropout is a no-op)."""
    n, cin, h, w = x_nchw.shape
    cin_pad = params["bn1_scale"].shape[1]
    cout_pad = params["bn2_scale"].shape[1]

    x = jnp.transpose(x_nchw, (0, 2, 3, 1))                    # NCHW -> NHWC
    if cin_pad != cin:
        x = jnp.pad(x, ((0, 0), (0, 0), (0, 0), (0, cin_pad - cin)))

    # h = relu1(bn1(x)) -- feeds both the conv path and the shortcut.
    hact = bn_relu(x, params["bn1_scale"], params["bn1_shift"],
                   out_dtype=jnp.bfloat16)

    # conv1 (3x3, stride) with bn2 + relu2 fused into the GEMM epilogue.
    patches1, ho, wo = im2col(hact, 3, 3, stride, 1)
    w1 = params["conv1_w"].reshape(9 * cin_pad, cout_pad)
    o1 = conv_gemm_bn_relu(patches1, w1,
                           params["bn2_scale"], params["bn2_shift"],
                           out_dtype=jnp.bfloat16)             # (M2, Cout_pad)
    # TODO(synk): dropRate>0 dropout is intentionally a no-op (eval semantics).

    m2 = n * ho * wo
    if equal_in_out:
        shortcut = x.reshape(n * h * w, cin_pad)               # identity (f32)
    else:
        sc_in = hact[:, ::stride, ::stride, :].reshape(m2, cin_pad)
        ws = params["shortcut_w"].reshape(cin_pad, cout_pad)
        shortcut = conv_gemm(sc_in, ws, out_dtype=jnp.float32)  # 1x1 projection

    # conv2 (3x3, stride 1) with the residual add fused into the GEMM epilogue.
    patches2, _, _ = im2col(o1.reshape(n, ho, wo, cout_pad), 3, 3, 1, 1)
    w2 = params["conv2_w"].reshape(9 * cout_pad, cout_pad)
    y = conv_gemm_add(patches2, w2, shortcut, out_dtype=jnp.float32)

    y = y.reshape(n, ho, wo, cout_pad)[..., :out_planes]
    return jnp.transpose(y, (0, 3, 1, 2))                      # NHWC -> NCHW


# ----------------------------- reference (plain JAX) -----------------------------

def basic_block_reference(params, x_nchw, *, stride, equal_in_out,
                          in_planes, out_planes):
    x = jnp.transpose(x_nchw, (0, 2, 3, 1)).astype(jnp.float32)
    s1 = params["bn1_scale"][0, :in_planes]
    t1 = params["bn1_shift"][0, :in_planes]
    h = jnp.maximum(x * s1 + t1, 0.0)
    w1 = params["conv1_w"][:, :, :in_planes, :out_planes].astype(jnp.float32)
    o = lax.conv_general_dilated(h, w1, (stride, stride), ((1, 1), (1, 1)),
                                 dimension_numbers=("NHWC", "HWIO", "NHWC"))
    s2 = params["bn2_scale"][0, :out_planes]
    t2 = params["bn2_shift"][0, :out_planes]
    o = jnp.maximum(o * s2 + t2, 0.0)
    w2 = params["conv2_w"][:, :, :out_planes, :out_planes].astype(jnp.float32)
    o = lax.conv_general_dilated(o, w2, (1, 1), ((1, 1), (1, 1)),
                                 dimension_numbers=("NHWC", "HWIO", "NHWC"))
    if equal_in_out:
        sc = x
    else:
        ws = params["shortcut_w"][:, :, :in_planes, :out_planes].astype(jnp.float32)
        sc = lax.conv_general_dilated(h, ws, (stride, stride), ((0, 0), (0, 0)),
                                      dimension_numbers=("NHWC", "HWIO", "NHWC"))
    return jnp.transpose(sc + o, (0, 3, 1, 2))


# ----------------------------- parameter init -----------------------------

def init_block_params(key, in_planes, out_planes, equal_in_out, eps=1e-5):
    cin_pad = _round_up(in_planes, 128)
    cout_pad = _round_up(out_planes, 128)
    ks = jax.random.split(key, 11)

    def conv_w(k, kh, kw, cin, cout, cin_p, cout_p):
        std = math.sqrt(2.0 / (cout * kh * kw))     # kaiming_normal_, fan_out
        wgt = jax.random.normal(k, (kh, kw, cin, cout), jnp.float32) * std
        wgt = jnp.pad(wgt, ((0, 0), (0, 0), (0, cin_p - cin), (0, cout_p - cout)))
        return wgt.astype(jnp.bfloat16)             # zero-pad + cast once

    def bn_fold(kg, kb, km, kv, c, c_pad):
        gamma = 1.0 + 0.1 * jax.random.normal(kg, (c,), jnp.float32)
        beta = 0.1 * jax.random.normal(kb, (c,), jnp.float32)
        mean = 0.1 * jax.random.normal(km, (c,), jnp.float32)
        var = 1.0 + 0.1 * jnp.abs(jax.random.normal(kv, (c,), jnp.float32))
        scale = gamma / jnp.sqrt(var + eps)
        shift = beta - mean * scale
        return (jnp.pad(scale, (0, c_pad - c)).reshape(1, c_pad),
                jnp.pad(shift, (0, c_pad - c)).reshape(1, c_pad))

    p = {}
    p["bn1_scale"], p["bn1_shift"] = bn_fold(ks[0], ks[1], ks[2], ks[3],
                                             in_planes, cin_pad)
    p["conv1_w"] = conv_w(ks[4], 3, 3, in_planes, out_planes, cin_pad, cout_pad)
    p["bn2_scale"], p["bn2_shift"] = bn_fold(ks[5], ks[6], ks[7], ks[8],
                                             out_planes, cout_pad)
    p["conv2_w"] = conv_w(ks[9], 3, 3, out_planes, out_planes, cout_pad, cout_pad)
    if not equal_in_out:
        p["shortcut_w"] = conv_w(ks[10], 1, 1, in_planes, out_planes,
                                 cin_pad, cout_pad)
    return p


# ----------------------------- entry point -----------------------------

if __name__ == "__main__":
    key = jax.random.PRNGKey(0)
    kp1, kx1, kp2, kx2 = jax.random.split(key, 4)

    # Case A: projection shortcut (in_planes != out_planes), stride 2.
    in_a, out_a, stride_a = 16, 32, 2
    params_a = init_block_params(kp1, in_a, out_a, equal_in_out=False)
    x_a = jax.random.normal(kx1, (2, in_a, 16, 16), jnp.float32)
    fwd_a = jax.jit(lambda p, x: basic_block_forward(
        p, x, stride=stride_a, equal_in_out=False, out_planes=out_a))
    y_a = fwd_a(params_a, x_a)
    jax.block_until_ready(y_a)
    assert y_a.shape == (2, out_a, 8, 8)
    ref_a = basic_block_reference(params_a, x_a, stride=stride_a,
                                  equal_in_out=False,
                                  in_planes=in_a, out_planes=out_a)
    err_a = float(jnp.linalg.norm(y_a - ref_a) /
                  (jnp.linalg.norm(ref_a) + 1e-6))
    assert err_a < 0.05, f"case A relative error too large: {err_a}"

    # Case B: identity shortcut (in_planes == out_planes), stride 1.
    in_b = out_b = 32
    params_b = init_block_params(kp2, in_b, out_b, equal_in_out=True)
    x_b = jax.random.normal(kx2, (2, in_b, 16, 16), jnp.float32)
    fwd_b = jax.jit(lambda p, x: basic_block_forward(
        p, x, stride=1, equal_in_out=True, out_planes=out_b))
    y_b = fwd_b(params_b, x_b)
    jax.block_until_ready(y_b)
    assert y_b.shape == (2, out_b, 16, 16)
    ref_b = basic_block_reference(params_b, x_b, stride=1, equal_in_out=True,
                                  in_planes=in_b, out_planes=out_b)
    err_b = float(jnp.linalg.norm(y_b - ref_b) /
                  (jnp.linalg.norm(ref_b) + 1e-6))
    assert err_b < 0.05, f"case B relative error too large: {err_b}"

    print("KERNEL_OK")
</pallas_src>

<mosaic_0001>
module attributes {stable_mosaic.version = 11 : i64} {
  func.func @bn_relu_kernel(%arg0: i32, %arg1: memref<256x128xf32, #tpu.memory_space<vmem>>, %arg2: memref<1x128xf32, #tpu.memory_space<vmem>>, %arg3: memref<1x128xf32, #tpu.memory_space<vmem>>, %arg4: memref<256x128xbf16, #tpu.memory_space<vmem>>) attributes {dimension_semantics = [#tpu.dimension_semantics<parallel>], iteration_bounds = array<i64: 2>, scalar_prefetch = 0 : i64, scratch_operands = 0 : i64, tpu.core_type = #tpu.core_type<tc>, window_params = [{transform_indices = @transform_0, window_bounds = array<i64: 256, 128>}, {pipeline_mode = #tpu.pipeline_mode<synchronous>, transform_indices = @transform_1, window_bounds = array<i64: 1, 128>}, {pipeline_mode = #tpu.pipeline_mode<synchronous>, transform_indices = @transform_2, window_bounds = array<i64: 1, 128>}, {transform_indices = @transform_3, window_bounds = array<i64: 256, 128>}]} {
    %c0 = arith.constant 0 : index
    %c0_0 = arith.constant 0 : index
    %0 = vector.load %arg1[%c0, %c0_0] : memref<256x128xf32, #tpu.memory_space<vmem>>, vector<256x128xf32>
    %c0_1 = arith.constant 0 : index
    %c0_2 = arith.constant 0 : index
    %1 = vector.load %arg2[%c0_1, %c0_2] : memref<1x128xf32, #tpu.memory_space<vmem>>, vector<1x128xf32>
    %2 = vector.broadcast %1 : vector<1x128xf32> to vector<256x128xf32>
    %3 = arith.mulf %0, %2 : vector<256x128xf32>
    %c0_3 = arith.constant 0 : index
    %c0_4 = arith.constant 0 : index
    %4 = vector.load %arg3[%c0_3, %c0_4] : memref<1x128xf32, #tpu.memory_space<vmem>>, vector<1x128xf32>
    %5 = vector.broadcast %4 : vector<1x128xf32> to vector<256x128xf32>
    %6 = arith.addf %3, %5 : vector<256x128xf32>
    %cst = arith.constant 0.000000e+00 : f32
    %7 = vector.broadcast %cst : f32 to vector<256x128xf32>
    %8 = arith.maximumf %6, %7 : vector<256x128xf32>
    %9 = arith.truncf %8 : vector<256x128xf32> to vector<256x128xbf16>
    %c0_5 = arith.constant 0 : index
    %c0_6 = arith.constant 0 : index
    %10 = vector.load %arg4[%c0_5, %c0_6] : memref<256x128xbf16, #tpu.memory_space<vmem>>, vector<256x128xbf16>
    tpu.vector_store %arg4[%c0_5, %c0_6], %9 {strides = array<i32>} : memref<256x128xbf16, #tpu.memory_space<vmem>>, vector<256x128xbf16>,
    return
  }
  func.func @transform_0(%arg0: i32) -> (i32, i32) {
    %c0_i32 = arith.constant 0 : i32
    %c0_i32_0 = arith.constant 0 : i32
    return %arg0, %c0_i32 : i32, i32
  }
  func.func @transform_1(%arg0: i32) -> (i32, i32) {
    %c0_i32 = arith.constant 0 : i32
    %c0_i32_0 = arith.constant 0 : i32
    %c0_i32_1 = arith.constant 0 : i32
    return %c0_i32, %c0_i32_0 : i32, i32
  }
  func.func @transform_2(%arg0: i32) -> (i32, i32) {
    %c0_i32 = arith.constant 0 : i32
    %c0_i32_0 = arith.constant 0 : i32
    %c0_i32_1 = arith.constant 0 : i32
    return %c0_i32, %c0_i32_0 : i32, i32
  }
  func.func @transform_3(%arg0: i32) -> (i32, i32) {
    %c0_i32 = arith.constant 0 : i32
    %c0_i32_0 = arith.constant 0 : i32
    return %arg0, %c0_i32 : i32, i32
  }
}

module attributes {stable_mosaic.version = 11 : i64} {
  func.func @conv_gemm_kernel(%arg0: i32, %arg1: memref<64x128xbf16, #tpu.memory_space<vmem>>, %arg2: memref<128x128xbf16, #tpu.memory_space<vmem>>, %arg3: memref<64x128xf32, #tpu.memory_space<vmem>>) attributes {dimension_semantics = [#tpu.dimension_semantics<parallel>], iteration_bounds = array<i64: 2>, scalar_prefetch = 0 : i64, scratch_operands = 0 : i64, tpu.core_type = #tpu.core_type<tc>, window_params = [{transform_indices = @transform_0, window_bounds = array<i64: 64, 128>}, {pipeline_mode = #tpu.pipeline_mode<synchronous>, transform_indices = @transform_1, window_bounds = array<i64: 128, 128>}, {transform_indices = @transform_2, window_bounds = array<i64: 64, 128>}]} {
    %c0 = arith.constant 0 : index
    %c0_0 = arith.constant 0 : index
    %0 = vector.load %arg1[%c0, %c0_0] : memref<64x128xbf16, #tpu.memory_space<vmem>>, vector<64x128xbf16>
    %c0_1 = arith.constant 0 : index
    %c0_2 = arith.constant 0 : index
    %1 = vector.load %arg2[%c0_1, %c0_2] : memref<128x128xbf16, #tpu.memory_space<vmem>>, vector<128x128xbf16>
    %cst = arith.constant dense<0.000000e+00> : vector<64x128xf32>
    %2 = tpu.matmul %0, %1, %cst {dimension_numbers = #tpu.dot_dimension_numbers<[1], [0], [0], [1], [0, 0, 1, 1], [], []>} : vector<64x128xbf16>, vector<128x128xbf16>, vector<64x128xf32> -> vector<64x128xf32>
    %c0_3 = arith.constant 0 : index
    %c0_4 = arith.constant 0 : index
    %3 = vector.load %arg3[%c0_3, %c0_4] : memref<64x128xf32, #tpu.memory_space<vmem>>, vector<64x128xf32>
    tpu.vector_store %arg3[%c0_3, %c0_4], %2 {strides = array<i32>} : memref<64x128xf32, #tpu.memory_space<vmem>>, vector<64x128xf32>,
    return
  }
  func.func @transform_0(%arg0: i32) -> (i32, i32) {
    %c0_i32 = arith.constant 0 : i32
    %c0_i32_0 = arith.constant 0 : i32
    return %arg0, %c0_i32 : i32, i32
  }
  func.func @transform_1(%arg0: i32) -> (i32, i32) {
    %c0_i32 = arith.constant 0 : i32
    %c0_i32_0 = arith.constant 0 : i32
    %c0_i32_1 = arith.constant 0 : i32
    return %c0_i32, %c0_i32_0 : i32, i32
  }
  func.func @transform_2(%arg0: i32) -> (i32, i32) {
    %c0_i32 = arith.constant 0 : i32
    %c0_i32_0 = arith.constant 0 : i32
    return %arg0, %c0_i32 : i32, i32
  }
}

module attributes {stable_mosaic.version = 11 : i64} {
  func.func @conv_gemm_bn_relu_kernel(%arg0: i32, %arg1: memref<64x1152xbf16, #tpu.memory_space<vmem>>, %arg2: memref<1152x128xbf16, #tpu.memory_space<vmem>>, %arg3: memref<1x128xf32, #tpu.memory_space<vmem>>, %arg4: memref<1x128xf32, #tpu.memory_space<vmem>>, %arg5: memref<64x128xbf16, #tpu.memory_space<vmem>>) attributes {dimension_semantics = [#tpu.dimension_semantics<parallel>], iteration_bounds = array<i64: 2>, scalar_prefetch = 0 : i64, scratch_operands = 0 : i64, tpu.core_type = #tpu.core_type<tc>, window_params = [{transform_indices = @transform_0, window_bounds = array<i64: 64, 1152>}, {pipeline_mode = #tpu.pipeline_mode<synchronous>, transform_indices = @transform_1, window_bounds = array<i64: 1152, 128>}, {pipeline_mode = #tpu.pipeline_mode<synchronous>, transform_indices = @transform_2, window_bounds = array<i64: 1, 128>}, {pipeline_mode = #tpu.pipeline_mode<synchronous>, transform_indices = @transform_3, window_bounds = array<i64: 1, 128>}, {transform_indices = @transform_4, window_bounds = array<i64: 64, 128>}]} {
    %c0 = arith.constant 0 : index
    %c0_0 = arith.constant 0 : index
    %0 = vector.load %arg1[%c0, %c0_0] : memref<64x1152xbf16, #tpu.memory_space<vmem>>, vector<64x1152xbf16>
    %c0_1 = arith.constant 0 : index
    %c0_2 = arith.constant 0 : index
    %1 = vector.load %arg2[%c0_1, %c0_2] : memref<1152x128xbf16, #tpu.memory_space<vmem>>, vector<1152x128xbf16>
    %cst = arith.constant dense<0.000000e+00> : vector<64x128xf32>
    %2 = tpu.matmul %0, %1, %cst {dimension_numbers = #tpu.dot_dimension_numbers<[1], [0], [0], [1], [0, 0, 1, 1], [], []>} : vector<64x1152xbf16>, vector<1152x128xbf16>, vector<64x128xf32> -> vector<64x128xf32>
    %c0_3 = arith.constant 0 : index
    %c0_4 = arith.constant 0 : index
    %3 = vector.load %arg3[%c0_3, %c0_4] : memref<1x128xf32, #tpu.memory_space<vmem>>, vector<1x128xf32>
    %4 = vector.broadcast %3 : vector<1x128xf32> to vector<64x128xf32>
    %5 = arith.mulf %2, %4 : vector<64x128xf32>
    %c0_5 = arith.constant 0 : index
    %c0_6 = arith.constant 0 : index
    %6 = vector.load %arg4[%c0_5, %c0_6] : memref<1x128xf32, #tpu.memory_space<vmem>>, vector<1x128xf32>
    %7 = vector.broadcast %6 : vector<1x128xf32> to vector<64x128xf32>
    %8 = arith.addf %5, %7 : vector<64x128xf32>
    %cst_7 = arith.constant 0.000000e+00 : f32
    %9 = vector.broadcast %cst_7 : f32 to vector<64x128xf32>
    %10 = arith.maximumf %8, %9 : vector<64x128xf32>
    %11 = arith.truncf %10 : vector<64x128xf32> to vector<64x128xbf16>
    %c0_8 = arith.constant 0 : index
    %c0_9 = arith.constant 0 : index
    %12 = vector.load %arg5[%c0_8, %c0_9] : memref<64x128xbf16, #tpu.memory_space<vmem>>, vector<64x128xbf16>
    tpu.vector_store %arg5[%c0_8, %c0_9], %11 {strides = array<i32>} : memref<64x128xbf16, #tpu.memory_space<vmem>>, vector<64x128xbf16>,
    return
  }
  func.func @transform_0(%arg0: i32) -> (i32, i32) {
    %c0_i32 = arith.constant 0 : i32
    %c0_i32_0 = arith.constant 0 : i32
    return %arg0, %c0_i32 : i32, i32
  }
  func.func @transform_1(%arg0: i32) -> (i32, i32) {
    %c0_i32 = arith.constant 0 : i32
    %c0_i32_0 = arith.constant 0 : i32
    %c0_i32_1 = arith.constant 0 : i32
    return %c0_i32, %c0_i32_0 : i32, i32
  }
  func.func @transform_2(%arg0: i32) -> (i32, i32) {
    %c0_i32 = arith.constant 0 : i32
    %c0_i32_0 = arith.constant 0 : i32
    %c0_i32_1 = arith.constant 0 : i32
    return %c0_i32, %c0_i32_0 : i32, i32
  }
  func.func @transform_3(%arg0: i32) -> (i32, i32) {
    %c0_i32 = arith.constant 0 : i32
    %c0_i32_0 = arith.constant 0 : i32
    %c0_i32_1 = arith.constant 0 : i32
    return %c0_i32, %c0_i32_0 : i32, i32
  }
  func.func @transform_4(%arg0: i32) -> (i32, i32) {
    %c0_i32 = arith.constant 0 : i32
    %c0_i32_0 = arith.constant 0 : i32
    return %arg0, %c0_i32 : i32, i32
  }
}

module attributes {stable_mosaic.version = 11 : i64} {
  func.func @conv_gemm_add_kernel(%arg0: i32, %arg1: memref<64x1152xbf16, #tpu.memory_space<vmem>>, %arg2: memref<1152x128xbf16, #tpu.memory_space<vmem>>, %arg3: memref<64x128xf32, #tpu.memory_space<vmem>>, %arg4: memref<64x128xf32, #tpu.memory_space<vmem>>) attributes {dimension_semantics = [#tpu.dimension_semantics<parallel>], iteration_bounds = array<i64: 2>, scalar_prefetch = 0 : i64, scratch_operands = 0 : i64, tpu.core_type = #tpu.core_type<tc>, window_params = [{transform_indices = @transform_0, window_bounds = array<i64: 64, 1152>}, {pipeline_mode = #tpu.pipeline_mode<synchronous>, transform_indices = @transform_1, window_bounds = array<i64: 1152, 128>}, {transform_indices = @transform_2, window_bounds = array<i64: 64, 128>}, {transform_indices = @transform_3, window_bounds = array<i64: 64, 128>}]} {
    %c0 = arith.constant 0 : index
    %c0_0 = arith.constant 0 : index
    %0 = vector.load %arg1[%c0, %c0_0] : memref<64x1152xbf16, #tpu.memory_space<vmem>>, vector<64x1152xbf16>
    %c0_1 = arith.constant 0 : index
    %c0_2 = arith.constant 0 : index
    %1 = vector.load %arg2[%c0_1, %c0_2] : memref<1152x128xbf16, #tpu.memory_space<vmem>>, vector<1152x128xbf16>
    %cst = arith.constant dense<0.000000e+00> : vector<64x128xf32>
    %2 = tpu.matmul %0, %1, %cst {dimension_numbers = #tpu.dot_dimension_numbers<[1], [0], [0], [1], [0, 0, 1, 1], [], []>} : vector<64x1152xbf16>, vector<1152x128xbf16>, vector<64x128xf32> -> vector<64x128xf32>
    %c0_3 = arith.constant 0 : index
    %c0_4 = arith.constant 0 : index
    %3 = vector.load %arg3[%c0_3, %c0_4] : memref<64x128xf32, #tpu.memory_space<vmem>>, vector<64x128xf32>
    %4 = arith.addf %2, %3 : vector<64x128xf32>
    %c0_5 = arith.constant 0 : index
    %c0_6 = arith.constant 0 : index
    %5 = vector.load %arg4[%c0_5, %c0_6] : memref<64x128xf32, #tpu.memory_space<vmem>>, vector<64x128xf32>
    tpu.vector_store %arg4[%c0_5, %c0_6], %4 {strides = array<i32>} : memref<64x128xf32, #tpu.memory_space<vmem>>, vector<64x128xf32>,
    return
  }
  func.func @transform_0(%arg0: i32) -> (i32, i32) {
    %c0_i32 = arith.constant 0 : i32
    %c0_i32_0 = arith.constant 0 : i32
    return %arg0, %c0_i32 : i32, i32
  }
  func.func @transform_1(%arg0: i32) -> (i32, i32) {
    %c0_i32 = arith.constant 0 : i32
    %c0_i32_0 = arith.constant 0 : i32
    %c0_i32_1 = arith.constant 0 : i32
    return %c0_i32, %c0_i32_0 : i32, i32
  }
  func.func @transform_2(%arg0: i32) -> (i32, i32) {
    %c0_i32 = arith.constant 0 : i32
    %c0_i32_0 = arith.constant 0 : i32
    return %arg0, %c0_i32 : i32, i32
  }
  func.func @transform_3(%arg0: i32) -> (i32, i32) {
    %c0_i32 = arith.constant 0 : i32
    %c0_i32_0 = arith.constant 0 : i32
    return %arg0, %c0_i32 : i32, i32
  }
}

</mosaic_0001>

<bundles_post_ra>
// kernel: _lambda_.4
= control target key start
LH: loop header
LB: loop body
LE: loop exit
PB: predicated region body
PF: predicated region fallthrough
CT: control target
= control target key end

     0   :  { %s740_s12 = smov 0   ;;  %s887_s0 = inlined_call_operand.vmem [shape: f32[512,128], index: 0, kind: input, shape index: {}]   ;;  %s888_s1 = inlined_call_operand.vmem [shape: f32[1,128], index: 1, kind: input, shape index: {}]   ;;  %s889_s2 = inlined_call_operand.vmem [shape: f32[1,128], index: 2, kind: input, shape index: {}]   ;;  %s890_s3 = inlined_call_operand.vmem [shape: bf16[512,128], index: 3, kind: output, shape index: {}]  }
   0x1 LB: > { %s532_s13 = sadd.s32 4294967295, %s718_s12   ;;  %p536_p0 = scmp.ge.s32.totalorder %s718_s12, 1  ;;  %s718_s12 = sphi %s740_s12, %s13_s12  }
   0x2   : > { %p138_p1 = scmp.lt.s32.totalorder %s718_s12, 3 }
   0x4   : > { %p139_p2 = pnand %p536_p0, %p138_p1 }
   0x5   : > { %s537_s14 = sshll.u32 (!%p139_p2), %s532_s13, 5 }
   0x6   : > { %142 = sbr.rel (%p139_p2) target bundleno = 49 (0x31), region = 32  ;;  %p163_p3 = scmp.lt.s32.totalorder (!%p139_p2), %s537_s14, 63 }
   0xb   : > { %s892_s14 = smov (!%p163_p3, %s537_s14), 63  ;;  %v754_v0 = vld [vmem:[%s888_s1] ss:$0 sm:$0xff] }
   0xc   : > { %s538_s15 = sshll.u32 %s892_s14, 3  ;;  %v764_v1 = vld [vmem:[%s889_s2] ss:$0 sm:$0xff]  ;;  %s540_s23 = sshll.u32 %s892_s14, 2 }
   0xd   : > { %s759_s20 = scalar_lea.vmem %s887_s0, %s538_s15  ;;  %s796_s26 = scalar_lea.vmem %s890_s3, %s540_s23 }
   0xe   : > { %v174_v2 = vld [vmem:[%s759_s20] sm:$0xff]  ;;  %v175_v3 = vld [vmem:[%s759_s20 + $0x8] sm:$0xff]  ;;  %v176_v4 = vld [vmem:[%s759_s20 + $0x10] sm:$0xff] }
   0xf   : > { %v213_v5 = vmul.f32 %v754_v0, %v174_v2  ;;  %v214_v6 = vmul.f32 %v754_v0, %v175_v3  ;;  %v177_v7 = vld [vmem:[%s759_s20 + $0x18] sm:$0xff]  ;;  %v215_v8 = vmul.f32 %v754_v0, %v176_v4  ;;  %v178_v9 = vld [vmem:[%s759_s20 + $0x20] sm:$0xff]  ;;  %v179_v10 = vld [vmem:[%s759_s20 + $0x28] sm:$0xff] }
  0x10   : > { %v216_v11 = vmul.f32 %v754_v0, %v177_v7  ;;  %v217_v12 = vmul.f32 %v754_v0, %v178_v9  ;;  %v218_v13 = vmul.f32 %v754_v0, %v179_v10  ;;  %v180_v14 = vld [vmem:[%s759_s20 + $0x30] sm:$0xff]  ;;  %v181_v15 = vld [vmem:[%s759_s20 + $0x38] sm:$0xff]  ;;  %v182_v24 = vld [vmem:[%s759_s20 + $0x40] sm:$0xff] }
  0x11   : > { %v252_v16 = vadd.f32 %v764_v1, %v213_v5  ;;  %v253_v17 = vadd.f32 %v764_v1, %v214_v6  ;;  %v254_v18 = vadd.f32 %v764_v1, %v215_v8  ;;  %v219_v19 = vmul.f32 %v754_v0, %v180_v14  ;;  %v183_v25 = vld [vmem:[%s759_s20 + $0x48] sm:$0xff]  ;;  %v184_v30 = vld [vmem:[%s759_s20 + $0x50] sm:$0xff]  ;;  %v185_v35 = vld [vmem:[%s759_s20 + $0x58] sm:$0xff] }
  0x12   : > { %v255_v20 = vadd.f32 %v764_v1, %v216_v11  ;;  %v256_v21 = vadd.f32 %v764_v1, %v217_v12  ;;  %v257_v22 = vadd.f32 %v764_v1, %v218_v13  ;;  %v220_v23 = vmul.f32 %v754_v0, %v181_v15  ;;  %v186_v36 = vld [vmem:[%s759_s20 + $0x60] sm:$0xff]  ;;  %v187_v41 = vld [vmem:[%s759_s20 + $0x68] sm:$0xff]  ;;  %v188_v42 = vld [vmem:[%s759_s20 + $0x70] sm:$0xff] }
  0x13   : > { %v284_v26 = vmax.f32 %v252_v16, 0.0  ;;  %v285_v27 = vmax.f32 %v253_v17, 0.0  ;;  %v286_v28 = vmax.f32 %v254_v18, 0.0  ;;  %v258_v29 = vadd.f32 %v764_v1, %v219_v19  ;;  %v189_v51 = vld [vmem:[%s759_s20 + $0x78] sm:$0xff]  ;;  %v190_v56 = vld [vmem:[%s759_s20 + $0x80] sm:$0xff]  ;;  %v191_v61 = vld [vmem:[%s759_s20 + $0x88] sm:$0xff] }
  0x14   : > { %v287_v31 = vmax.f32 %v255_v20, 0.0  ;;  %v288_v32 = vmax.f32 %v256_v21, 0.0  ;;  %v289_v33 = vmax.f32 %v257_v22, 0.0  ;;  %v259_v34 = vadd.f32 %v764_v1, %v220_v23  ;;  %v192_v4 = vld [vmem:[%s759_s20 + $0x90] sm:$0xff]  ;;  %v193_v5 = vld [vmem:[%s759_s20 + $0x98] sm:$0xff]  ;;  %v194_v10 = vld [vmem:[%s759_s20 + $0xa0] sm:$0xff] }
  0x15   : > { %v612_v37 = vpack.c.bf16 %v285_v27, %v284_v26  ;;  %v290_v38 = vmax.f32 %v258_v29, 0.0  ;;  %v221_v39 = vmul.f32 %v754_v0, %v182_v24  ;;  %v222_v40 = vmul.f32 %v754_v0, %v183_v25  ;;  %v195_v15 = vld [vmem:[%s759_s20 + $0xa8] sm:$0xff]  ;;  %v196_v20 = vld [vmem:[%s759_s20 + $0xb0] sm:$0xff]  ;;  %v197_v25 = vld [vmem:[%s759_s20 + $0xb8] sm:$0xff] }
  0x16   : > { %v617_v43 = vpack.c.bf16 %v287_v31, %v286_v28  ;;  %v622_v44 = vpack.c.bf16 %v289_v33, %v288_v32  ;;  %v291_v45 = vmax.f32 %v259_v34, 0.0  ;;  %v223_v46 = vmul.f32 %v754_v0, %v184_v30  ;;  %v198_v30 = vld [vmem:[%s759_s20 + $0xc0] sm:$0xff] }
  0x17   : > { %613 = vst [vmem:[%s796_s26] sm:$0xff] %v612_v37   ;;  %v260_v47 = vadd.f32 %v764_v1, %v221_v39  ;;  %v261_v48 = vadd.f32 %v764_v1, %v222_v40  ;;  %v224_v49 = vmul.f32 %v754_v0, %v185_v35  ;;  %v225_v50 = vmul.f32 %v754_v0, %v186_v36  ;;  %v199_v35 = vld [vmem:[%s759_s20 + $0xc8] sm:$0xff]  ;;  %v200_v40 = vld [vmem:[%s759_s20 + $0xd0] sm:$0xff] }
  0x18   : > { %689 = vst [vmem:[%s796_s26 + $0x8] sm:$0xff] %v617_v43   ;;  %690 = vst [vmem:[%s796_s26 + $0x10] sm:$0xff] %v622_v44   ;;  %v627_v52 = vpack.c.bf16 %v291_v45, %v290_v38  ;;  %v262_v53 = vadd.f32 %v764_v1, %v223_v46  ;;  %v226_v54 = vmul.f32 %v754_v0, %v187_v41  ;;  %v201_v41 = vld [vmem:[%s759_s20 + $0xd8] sm:$0xff]  ;;  %v202_v46 = vld [vmem:[%s759_s20 + $0xe0] sm:$0xff] }
  0x19   : > { %v227_v55 = vmul.f32 %v754_v0, %v188_v42  ;;  %v292_v57 = vmax.f32 %v260_v47, 0.0  ;;  %v293_v58 = vmax.f32 %v261_v48, 0.0  ;;  %v263_v59 = vadd.f32 %v764_v1, %v224_v49 }
  0x1a   : > { %v264_v60 = vadd.f32 %v764_v1, %v225_v50  ;;  %691 = vst [vmem:[%s796_s26 + $0x18] sm:$0xff] %v627_v52   ;;  %v294_v62 = vmax.f32 %v262_v53, 0.0  ;;  %v265_v63 = vadd.f32 %v764_v1, %v226_v54  ;;  %v228_v2 = vmul.f32 %v754_v0, %v189_v51  ;;  %v203_v51 = vld [vmem:[%s759_s20 + $0xe8] sm:$0xff] }
  0x1b   : > { %v266_v3 = vadd.f32 %v764_v1, %v227_v55  ;;  %v632_v6 = vpack.c.bf16 %v293_v58, %v292_v57  ;;  %v295_v7 = vmax.f32 %v263_v59, 0.0  ;;  %v229_v9 = vmul.f32 %v754_v0, %v190_v56  ;;  %v204_v56 = vld [vmem:[%s759_s20 + $0xf0] sm:$0xff] }
  0x1c   : > { %v296_v8 = vmax.f32 %v264_v60, 0.0  ;;  %v297_v11 = vmax.f32 %v265_v63, 0.0  ;;  %v267_v12 = vadd.f32 %v764_v1, %v228_v2  ;;  %v230_v14 = vmul.f32 %v754_v0, %v191_v61  ;;  %v205_v61 = vld [vmem:[%s759_s20 + $0xf8] sm:$0xff] }
  0x1d   : > { %v298_v13 = vmax.f32 %v266_v3, 0.0  ;;  %692 = vst [vmem:[%s796_s26 + $0x20] sm:$0xff] %v632_v6   ;;  %v637_v16 = vpack.c.bf16 %v295_v7, %v294_v62  ;;  %v268_v17 = vadd.f32 %v764_v1, %v229_v9  ;;  %v231_v18 = vmul.f32 %v754_v0, %v192_v4 }
  0x1e   : > { %v232_v19 = vmul.f32 %v754_v0, %v193_v5  ;;  %v642_v21 = vpack.c.bf16 %v297_v11, %v296_v8  ;;  %v299_v22 = vmax.f32 %v267_v12, 0.0  ;;  %v269_v23 = vadd.f32 %v764_v1, %v230_v14 }
  0x1f   : > { %v233_v24 = vmul.f32 %v754_v0, %v194_v10  ;;  %693 = vst [vmem:[%s796_s26 + $0x28] sm:$0xff] %v637_v16   ;;  %v300_v26 = vmax.f32 %v268_v17, 0.0  ;;  %v270_v27 = vadd.f32 %v764_v1, %v231_v18  ;;  %v234_v29 = vmul.f32 %v754_v0, %v195_v15 }
  0x20   : > { %v271_v28 = vadd.f32 %v764_v1, %v232_v19  ;;  %694 = vst [vmem:[%s796_s26 + $0x30] sm:$0xff] %v642_v21   ;;  %v647_v31 = vpack.c.bf16 %v299_v22, %v298_v13  ;;  %v301_v32 = vmax.f32 %v269_v23, 0.0  ;;  %v235_v34 = vmul.f32 %v754_v0, %v196_v20 }
  0x21   : > { %v272_v33 = vadd.f32 %v764_v1, %v233_v24  ;;  %v302_v36 = vmax.f32 %v270_v27, 0.0  ;;  %v273_v38 = vadd.f32 %v764_v1, %v234_v29  ;;  %v236_v39 = vmul.f32 %v754_v0, %v197_v25 }
  0x22   : > { %v303_v37 = vmax.f32 %v271_v28, 0.0  ;;  %695 = vst [vmem:[%s796_s26 + $0x38] sm:$0xff] %v647_v31   ;;  %v652_v42 = vpack.c.bf16 %v301_v32, %v300_v26  ;;  %v274_v44 = vadd.f32 %v764_v1, %v235_v34  ;;  %v237_v45 = vmul.f32 %v754_v0, %v198_v30 }
  0x23   : > { %v304_v43 = vmax.f32 %v272_v33, 0.0  ;;  %v305_v48 = vmax.f32 %v273_v38, 0.0  ;;  %v275_v49 = vadd.f32 %v764_v1, %v236_v39  ;;  %v238_v50 = vmul.f32 %v754_v0, %v199_v35 }
  0x24   : > { %v657_v47 = vpack.c.bf16 %v303_v37, %v302_v36  ;;  %696 = vst [vmem:[%s796_s26 + $0x40] sm:$0xff] %v652_v42   ;;  %v306_v52 = vmax.f32 %v274_v44, 0.0  ;;  %v276_v53 = vadd.f32 %v764_v1, %v237_v45  ;;  %v239_v54 = vmul.f32 %v754_v0, %v200_v40 }
  0x25   : > { %v240_v55 = vmul.f32 %v754_v0, %v201_v41  ;;  %v662_v57 = vpack.c.bf16 %v305_v48, %v304_v43  ;;  %v307_v58 = vmax.f32 %v275_v49, 0.0  ;;  %v277_v59 = vadd.f32 %v764_v1, %v238_v50 }
  0x26   : > { %697 = vst [vmem:[%s796_s26 + $0x48] sm:$0xff] %v657_v47   ;;  %v241_v60 = vmul.f32 %v754_v0, %v202_v46  ;;  %v308_v62 = vmax.f32 %v276_v53, 0.0  ;;  %v278_v63 = vadd.f32 %v764_v1, %v239_v54  ;;  %v242_v3 = vmul.f32 %v754_v0, %v203_v51 }
  0x27   : > { %v279_v2 = vadd.f32 %v764_v1, %v240_v55  ;;  %698 = vst [vmem:[%s796_s26 + $0x50] sm:$0xff] %v662_v57   ;;  %v667_v4 = vpack.c.bf16 %v307_v58, %v306_v52  ;;  %v309_v5 = vmax.f32 %v277_v59, 0.0  ;;  %v243_v7 = vmul.f32 %v754_v0, %v204_v56 }
  0x28   : > { %v280_v6 = vadd.f32 %v764_v1, %v241_v60  ;;  %v310_v8 = vmax.f32 %v278_v63, 0.0  ;;  %v281_v10 = vadd.f32 %v764_v1, %v242_v3  ;;  %v244_v11 = vmul.f32 %v754_v0, %v205_v61 }
  0x29   : > { %v311_v9 = vmax.f32 %v279_v2, 0.0  ;;  %699 = vst [vmem:[%s796_s26 + $0x58] sm:$0xff] %v667_v4   ;;  %v672_v12 = vpack.c.bf16 %v309_v5, %v308_v62  ;;  %v282_v14 = vadd.f32 %v764_v1, %v243_v7 }
  0x2a   : > { %v312_v13 = vmax.f32 %v280_v6, 0.0  ;;  %v313_v16 = vmax.f32 %v281_v10, 0.0  ;;  %v283_v17 = vadd.f32 %v764_v1, %v244_v11 }
  0x2b   : > { %v677_v15 = vpack.c.bf16 %v311_v9, %v310_v8  ;;  %700 = vst [vmem:[%s796_s26 + $0x60] sm:$0xff] %v672_v12   ;;  %v314_v18 = vmax.f32 %v282_v14, 0.0 }
  0x2c   : > { %v682_v19 = vpack.c.bf16 %v313_v16, %v312_v13  ;;  %v315_v20 = vmax.f32 %v283_v17, 0.0 }
  0x2d   : > { %701 = vst [vmem:[%s796_s26 + $0x68] sm:$0xff] %v677_v15  }
  0x2e   : > { %702 = vst [vmem:[%s796_s26 + $0x70] sm:$0xff] %v682_v19   ;;  %v687_v21 = vpack.c.bf16 %v315_v20, %v314_v18 }
  0x30   : > { %703 = vst [vmem:[%s796_s26 + $0x78] sm:$0xff] %v687_v21  }
  0x31 PF: > { %s13_s12 = sadd.s32 1, %s718_s12  }
  0x32   : > { %p10_p4 = scmp.ge.s32.totalorder %s13_s12, 4  }
  0x34   :  { %12 = sbr.rel (!%p10_p4) target bundleno = 1 (0x1), region = 62 }

// kernel: _lambda_.6
= control target key start
LH: loop header
LB: loop body
LE: loop exit
PB: predicated region body
PF: predicated region fallthrough
CT: control target
= control target key end

     0   :  { %s491_s9 = smov 0   ;;  %s542_s0 = inlined_call_operand.vmem [shape: bf16[128,128], index: 0, kind: input, shape index: {}]   ;;  %s543_s1 = inlined_call_operand.vmem [shape: bf16[128,128], index: 1, kind: input, shape index: {}]   ;;  %s544_s2 = inlined_call_operand.vmem [shape: f32[128,128], index: 2, kind: output, shape index: {}]  }
   0x1 LB: > { %s373_s10 = sadd.s32 4294967295, %s474_s9   ;;  %p377_p0 = scmp.ge.s32.totalorder %s474_s9, 1  ;;  %s474_s9 = sphi %s491_s9, %s12_s9  }
   0x2   : > { %p113_p1 = scmp.lt.s32.totalorder %s474_s9, 3 }
   0x4   : > { %p114_p2 = pnand %p377_p0, %p113_p1 }
   0x5   : > { %s378_s13 = sshll.u32 (!%p114_p2), %s373_s10, 3 }
   0x6   : > { %117 = sbr.rel (%p114_p2) target bundleno = 244 (0xf4), region = 28  ;;  %p136_p3 = scmp.lt.s32.totalorder (!%p114_p2), %s378_s13, 15 }
   0xb   : > { %v456_v0 = vld [vmem:[%s543_s1 + $0x38] sm:$0xff]   ;;  %v457_v1 = vld [vmem:[%s543_s1 + $0x30] sm:$0xff]   ;;  %s546_s13 = smov (!%p136_p3, %s378_s13), 15  ;;  %v458_v2 = vld [vmem:[%s543_s1 + $0x28] sm:$0xff]  }
   0xc   : > { %408 = vmatprep.subr.bf16.mxu0 %v456_v0  ;;  %432 = vmatprep.subr.bf16.mxu1 %v456_v0  ;;  %s379_s18 = sshll.u32 %s546_s13, 2  ;;  %v459_v3 = vld [vmem:[%s543_s1 + $0x20] sm:$0xff]   ;;  %v460_v6 = vld [vmem:[%s543_s1 + $0x18] sm:$0xff]   ;;  %v461_v7 = vld [vmem:[%s543_s1 + $0x10] sm:$0xff]   ;;  %s381_s4 = sshll.u32 %s546_s13, 3 }
   0xd   : > { %409 = vmatpush3.bf16.msra.mxu0 %v456_v0  ;;  %440 = vmatpush3.bf16.msra.mxu1 %v456_v0  ;;  %s514_s21 = scalar_lea.vmem %s542_s0, %s379_s18  ;;  %v462_v8 = vld [vmem:[%s543_s1 + $0x8] sm:$0xff]   ;;  %v463_v9 = vld [vmem:[%s543_s1] sm:$0xff]   ;;  %s145_s7 = scalar_lea.vmem %s544_s2, %s381_s4 }
   0xe   : > { %410 = vmatprep.subr.bf16.mxu0 %v457_v1  ;;  %433 = vmatprep.subr.bf16.mxu1 %v457_v1  ;;  %v464_v4 = vld [vmem:[%s514_s21] sm:$0xff]   ;;  %v465_v5 = vld [vmem:[%s514_s21 + $0x10] sm:$0xff]   ;;  %v466_v10 = vld [vmem:[%s514_s21 + $0x8] sm:$0xff]  }
   0xf   : > { %424 = vmatprep.mubr.bf16.mxu0 %v464_v4  ;;  %428 = vmatprep.mubr.bf16.mxu1 %v465_v5  ;;  %v467_v11 = vld [vmem:[%s514_s21 + $0x18] sm:$0xff]  }
  0x11   : > { %411 = vmatpush3.bf16.msra.mxu0 %v457_v1  ;;  %441 = vmatpush3.bf16.msra.mxu1 %v457_v1 }
  0x12   : > { %412 = vmatprep.subr.bf16.mxu0 %v458_v2  ;;  %434 = vmatprep.subr.bf16.mxu1 %v458_v2 }
  0x15   : > { %413 = vmatpush3.bf16.msra.mxu0 %v458_v2  ;;  %442 = vmatpush3.bf16.msra.mxu1 %v458_v2 }
  0x16   : > { %414 = vmatprep.subr.bf16.mxu0 %v459_v3  ;;  %435 = vmatprep.subr.bf16.mxu1 %v459_v3 }
  0x19   : > { %415 = vmatpush3.bf16.msra.mxu0 %v459_v3  ;;  %443 = vmatpush3.bf16.msra.mxu1 %v459_v3 }
  0x1a   : > { %416 = vmatprep.subr.bf16.mxu0 %v460_v6  ;;  %436 = vmatprep.subr.bf16.mxu1 %v460_v6 }
  0x1d   : > { %417 = vmatpush3.bf16.msra.mxu0 %v460_v6  ;;  %444 = vmatpush3.bf16.msra.mxu1 %v460_v6 }
  0x1e   : > { %418 = vmatprep.subr.bf16.mxu0 %v461_v7  ;;  %437 = vmatprep.subr.bf16.mxu1 %v461_v7 }
  0x21   : > { %419 = vmatpush3.bf16.msra.mxu0 %v461_v7  ;;  %445 = vmatpush3.bf16.msra.mxu1 %v461_v7 }
  0x22   : > { %420 = vmatprep.subr.bf16.mxu0 %v462_v8  ;;  %438 = vmatprep.subr.bf16.mxu1 %v462_v8 }
  0x25   : > { %421 = vmatpush3.bf16.msra.mxu0 %v462_v8  ;;  %446 = vmatpush3.bf16.msra.mxu1 %v462_v8 }
  0x26   : > { %422 = vmatprep.subr.bf16.mxu0 %v463_v9  ;;  %439 = vmatprep.subr.bf16.mxu1 %v463_v9 }
  0x29   : > { %423 = vmatpush3.bf16.msra.mxu0 %v463_v9  ;;  %447 = vmatpush3.bf16.msra.mxu1 %v463_v9 }
  0x2c   : > { %425 = vmatmul.mubr.bf16.vlgmr.msra.gmra.mxu0 %v466_v10  ;;  %429 = vmatmul.mubr.bf16.vlgmr.msra.gmra.mxu1 %v467_v11 }
  0xec   : > { %v426_v12 = vpop.f32.mrf.mxu0  ;;  %v430_v13 = vpop.f32.mrf.mxu1 }
  0xed   : > { %311 = vst [vmem:[%s145_s7 + $0x10] sm:$0xff] %v426_v12  ;;  %315 = vst [vmem:[%s145_s7 + $0x30] sm:$0xff] %v430_v13 }
  0xee   : > { %v278_v14 = vpop.f32.mrf.mxu0  ;;  %v294_v15 = vpop.f32.mrf.mxu1 }
  0xef   : > { %309 = vst [vmem:[%s145_s7] sm:$0xff] %v278_v14  ;;  %313 = vst [vmem:[%s145_s7 + $0x20] sm:$0xff] %v294_v15 }
  0xf0   : > { %v427_v16 = vpop.f32.mrf.mxu0  ;;  %v431_v17 = vpop.f32.mrf.mxu1 }
  0xf1   : > { %312 = vst [vmem:[%s145_s7 + $0x18] sm:$0xff] %v427_v16  ;;  %316 = vst [vmem:[%s145_s7 + $0x38] sm:$0xff] %v431_v17 }
  0xf2   : > { %v281_v18 = vpop.f32.mrf.mxu0  ;;  %v297_v19 = vpop.f32.mrf.mxu1 }
  0xf3   : > { %310 = vst [vmem:[%s145_s7 + $0x8] sm:$0xff] %v281_v18  ;;  %314 = vst [vmem:[%s145_s7 + $0x28] sm:$0xff] %v297_v19 }
  0xf4 PF: > { %s12_s9 = sadd.s32 1, %s474_s9  }
  0xf5   : > { %p9_p4 = scmp.ge.s32.totalorder %s12_s9, 4  }
  0xf7   :  { %11 = sbr.rel (!%p9_p4) target bundleno = 1 (0x1), region = 58 }

// kernel: _lambda_.5
= control target key start
LH: loop header
LB: loop body
LE: loop exit
PB: predicated region body
PF: predicated region fallthrough
CT: control target
= control target key end

     0   :  { %s2002_s15 = smov 0   ;;  %s2333_s0 = inlined_call_operand.vmem [shape: bf16[128,1152], index: 0, kind: input, shape index: {}]   ;;  %s2334_s1 = inlined_call_operand.vmem [shape: bf16[1152,128], index: 1, kind: input, shape index: {}]   ;;  %s2335_s2 = inlined_call_operand.vmem [shape: f32[1,128], index: 2, kind: input, shape index: {}]   ;;  %s2336_s3 = inlined_call_operand.vmem [shape: f32[1,128], index: 3, kind: input, shape index: {}]   ;;  %s2337_s4 = inlined_call_operand.vmem [shape: bf16[128,128], index: 4, kind: output, shape index: {}]  }
   0x1 LB: > { %s1464_s16 = sadd.s32 4294967295, %s1975_s15   ;;  %p1468_p0 = scmp.ge.s32.totalorder %s1975_s15, 1  ;;  %s1975_s15 = sphi %s2002_s15, %s14_s15  }
   0x2   : > { %p164_p1 = scmp.lt.s32.totalorder %s1975_s15, 3 }
   0x4   : > { %p165_p2 = pnand %p1468_p0, %p164_p1 }
   0x6   : > { %168 = sbr.rel (%p165_p2) target bundleno = 321 (0x141), region = 36 }
   0xb   : > { %v1845_v0 = vld [vmem:[%s2334_s1 + $0x78] sm:$0xff]   ;;  %v1849_v4 = vld [vmem:[%s2334_s1 + $0x70] sm:$0xff]   ;;  %v1853_v8 = vld [vmem:[%s2334_s1 + $0x68] sm:$0xff]   ;;  %s1469_s23 = sshll.u32 %s1464_s16, 3 }
   0xc   : > { %v1846_v1 = vld [vmem:[%s2334_s1 + $0xf8] sm:$0xff]   ;;  %1624 = vmatprep.subr.bf16.mxu0 %v1845_v0  ;;  %v1850_v5 = vld [vmem:[%s2334_s1 + $0xf0] sm:$0xff]   ;;  %v1854_v9 = vld [vmem:[%s2334_s1 + $0xe8] sm:$0xff]   ;;  %p192_p3 = scmp.lt.s32.totalorder %s1469_s23, 15 }
   0xd   : > { %v1847_v2 = vld [vmem:[%s2334_s1 + $0x38] sm:$0xff]   ;;  %1664 = vmatprep.subr.bf16.mxu1 %v1846_v1  ;;  %v1851_v6 = vld [vmem:[%s2334_s1 + $0x30] sm:$0xff]   ;;  %v1855_v10 = vld [vmem:[%s2334_s1 + $0x28] sm:$0xff]  }
   0xe   : > { %v1848_v3 = vld [vmem:[%s2334_s1 + $0xb8] sm:$0xff]   ;;  %1625 = vmatpush3.bf16.msra.mxu0 %v1847_v2  ;;  %v1852_v7 = vld [vmem:[%s2334_s1 + $0xb0] sm:$0xff]   ;;  %v1856_v11 = vld [vmem:[%s2334_s1 + $0xa8] sm:$0xff]   ;;  %s2355_s23 = smov (!%p192_p3, %s1469_s23), 15 }
   0xf   : > { %1665 = vmatpush3.bf16.msra.mxu1 %v1848_v3  ;;  %1626 = vmatprep.subr.bf16.mxu0 %v1849_v4  ;;  %v1857_v12 = vld [vmem:[%s2334_s1 + $0x60] sm:$0xff]   ;;  %v1861_v16 = vld [vmem:[%s2334_s1 + $0x58] sm:$0xff]   ;;  %v1865_v20 = vld [vmem:[%s2334_s1 + $0x50] sm:$0xff]   ;;  %s1836_s21 = smul.u32 36, %s2355_s23  ;;  %s1472_s28 = sshll.u32 %s2355_s23, 2 }
  0x10   : > { %1666 = vmatprep.subr.bf16.mxu1 %v1850_v5  ;;  %v1858_v13 = vld [vmem:[%s2334_s1 + $0xe0] sm:$0xff]   ;;  %v1862_v17 = vld [vmem:[%s2334_s1 + $0xd8] sm:$0xff]   ;;  %v1866_v21 = vld [vmem:[%s2334_s1 + $0xd0] sm:$0xff]   ;;  %s202_s5 = scalar_lea.vmem %s2337_s4, %s1472_s28 }
  0x11   : > { %v1859_v14 = vld [vmem:[%s2334_s1 + $0x20] sm:$0xff]   ;;  %v1863_v18 = vld [vmem:[%s2334_s1 + $0x18] sm:$0xff]   ;;  %v1867_v22 = vld [vmem:[%s2334_s1 + $0x10] sm:$0xff]   ;;  %s2108_s6 = scalar_lea.vmem %s2333_s0, %s1836_s21 }
  0x12   : > { %1627 = vmatpush3.bf16.msra.mxu0 %v1851_v6  ;;  %v1860_v15 = vld [vmem:[%s2334_s1 + $0xa0] sm:$0xff]   ;;  %v1864_v19 = vld [vmem:[%s2334_s1 + $0x98] sm:$0xff]   ;;  %v1868_v23 = vld [vmem:[%s2334_s1 + $0x90] sm:$0xff]  }
  0x13   : > { %1667 = vmatpush3.bf16.msra.mxu1 %v1852_v7  ;;  %1628 = vmatprep.subr.bf16.mxu0 %v1853_v8  ;;  %v1869_v24 = vld [vmem:[%s2334_s1 + $0x48] sm:$0xff]   ;;  %v1873_v28 = vld [vmem:[%s2334_s1 + $0x40] sm:$0xff]   ;;  %v1883_v36 = vld [vmem:[%s2334_s1 + $0x178] sm:$0xff]  }
  0x14   : > { %1668 = vmatprep.subr.bf16.mxu1 %v1854_v9  ;;  %v1870_v25 = vld [vmem:[%s2334_s1 + $0xc8] sm:$0xff]   ;;  %v1874_v29 = vld [vmem:[%s2334_s1 + $0xc0] sm:$0xff]   ;;  %v1884_v37 = vld [vmem:[%s2334_s1 + $0x1f8] sm:$0xff]  }
  0x15   : > { %v1871_v26 = vld [vmem:[%s2334_s1 + $0x8] sm:$0xff]   ;;  %v1875_v30 = vld [vmem:[%s2334_s1] sm:$0xff]   ;;  %v1885_v38 = vld [vmem:[%s2334_s1 + $0x138] sm:$0xff]  }
  0x16   : > { %1629 = vmatpush3.bf16.msra.mxu0 %v1855_v10  ;;  %v1872_v27 = vld [vmem:[%s2334_s1 + $0x88] sm:$0xff]   ;;  %v1876_v31 = vld [vmem:[%s2334_s1 + $0x80] sm:$0xff]   ;;  %v1886_v39 = vld [vmem:[%s2334_s1 + $0x1b8] sm:$0xff]  }
  0x17   : > { %1669 = vmatpush3.bf16.msra.mxu1 %v1856_v11  ;;  %1630 = vmatprep.subr.bf16.mxu0 %v1857_v12  ;;  %v1877_v32 = vld [vmem:[%s2108_s6] ss:$36 sps:$4 sm:$0xff]   ;;  %v1880_v34 = vld [vmem:[%s2108_s6 + $0x8] ss:$36 sps:$4 sm:$0xff]   ;;  %v1887_v40 = vld [vmem:[%s2334_s1 + $0x170] sm:$0xff]  }
  0x18   : > { %1670 = vmatprep.subr.bf16.mxu1 %v1858_v13  ;;  %v1879_v33 = vld [vmem:[%s2108_s6 + $0x4] ss:$36 sps:$4 sm:$0xff]   ;;  %v1882_v35 = vld [vmem:[%s2108_s6 + $0xc] ss:$36 sps:$4 sm:$0xff]   ;;  %v1893_v45 = vld [vmem:[%s2108_s6 + $0x54] ss:$36 sps:$4 sm:$0xff]  }
  0x19   : > { %1037 = vmatprep.mubr.bf16.mxu0 %v1879_v33  ;;  %1102 = vmatprep.mubr.bf16.mxu1 %v1882_v35  ;;  %v1888_v41 = vld [vmem:[%s2334_s1 + $0x1f0] sm:$0xff]   ;;  %v1895_v46 = vld [vmem:[%s2108_s6 + $0x48] ss:$36 sps:$4 sm:$0xff]   ;;  %v1901_v52 = vld [vmem:[%s2334_s1 + $0x160] sm:$0xff]  }
  0x1a   : > { %1631 = vmatpush3.bf16.msra.mxu0 %v1859_v14  ;;  %v1889_v42 = vld [vmem:[%s2334_s1 + $0x130] sm:$0xff]   ;;  %v1897_v48 = vld [vmem:[%s2334_s1 + $0x168] sm:$0xff]   ;;  %v1902_v53 = vld [vmem:[%s2334_s1 + $0x1e0] sm:$0xff]  }
  0x1b   : > { %1671 = vmatpush3.bf16.msra.mxu1 %v1860_v15  ;;  %1632 = vmatprep.subr.bf16.mxu0 %v1861_v16  ;;  %v1890_v43 = vld [vmem:[%s2334_s1 + $0x1b0] sm:$0xff]   ;;  %v1898_v49 = vld [vmem:[%s2334_s1 + $0x1e8] sm:$0xff]   ;;  %v1903_v54 = vld [vmem:[%s2334_s1 + $0x120] sm:$0xff]  }
  0x1c   : > { %1672 = vmatprep.subr.bf16.mxu1 %v1862_v17  ;;  %v1891_v44 = vld [vmem:[%s2108_s6 + $0x4c] ss:$36 sps:$4 sm:$0xff]   ;;  %v1904_v55 = vld [vmem:[%s2334_s1 + $0x1a0] sm:$0xff]   ;;  %v1905_v56 = vld [vmem:[%s2108_s6 + $0x94] ss:$36 sps:$4 sm:$0xff]  }
  0x1d   : > { %v1896_v47 = vld [vmem:[%s2108_s6 + $0x50] ss:$36 sps:$4 sm:$0xff]   ;;  %v1899_v50 = vld [vmem:[%s2334_s1 + $0x128] sm:$0xff]   ;;  %v1907_v57 = vld [vmem:[%s2108_s6 + $0x9c] ss:$36 sps:$4 sm:$0xff]  }
  0x1e   : > { %1633 = vmatpush3.bf16.msra.mxu0 %v1863_v18  ;;  %v1900_v51 = vld [vmem:[%s2334_s1 + $0x1a8] sm:$0xff]   ;;  %v1909_v58 = vld [vmem:[%s2108_s6 + $0x90] ss:$36 sps:$4 sm:$0xff]   ;;  %v1910_v59 = vld [vmem:[%s2108_s6 + $0x98] ss:$36 sps:$4 sm:$0xff]  }
  0x1f   : > { %1673 = vmatpush3.bf16.msra.mxu1 %v1864_v19  ;;  %1634 = vmatprep.subr.bf16.mxu0 %v1865_v20  ;;  %v1911_v60 = vld [vmem:[%s2334_s1 + $0x158] sm:$0xff]   ;;  %v1915_v0 = vld [vmem:[%s2334_s1 + $0x150] sm:$0xff]   ;;  %v1921_v5 = vld [vmem:[%s2108_s6 + $0xe4] ss:$36 sps:$4 sm:$0xff]  }
  0x20   : > { %1674 = vmatprep.subr.bf16.mxu1 %v1866_v21  ;;  %v1912_v61 = vld [vmem:[%s2334_s1 + $0x1d8] sm:$0xff]   ;;  %v1916_v1 = vld [vmem:[%s2334_s1 + $0x1d0] sm:$0xff]   ;;  %v1924_v7 = vld [vmem:[%s2108_s6 + $0xe0] ss:$36 sps:$4 sm:$0xff]  }
  0x21   : > { %v1913_v62 = vld [vmem:[%s2334_s1 + $0x118] sm:$0xff]   ;;  %v1917_v2 = vld [vmem:[%s2334_s1 + $0x110] sm:$0xff]   ;;  %v1925_v8 = vld [vmem:[%s2334_s1 + $0x148] sm:$0xff]  }
  0x22   : > { %1635 = vmatpush3.bf16.msra.mxu0 %v1867_v22  ;;  %v1914_v63 = vld [vmem:[%s2334_s1 + $0x198] sm:$0xff]   ;;  %v1918_v3 = vld [vmem:[%s2334_s1 + $0x190] sm:$0xff]   ;;  %v1926_v9 = vld [vmem:[%s2334_s1 + $0x1c8] sm:$0xff]  }
  0x23   : > { %1675 = vmatpush3.bf16.msra.mxu1 %v1868_v23  ;;  %1636 = vmatprep.subr.bf16.mxu0 %v1869_v24  ;;  %v1919_v4 = vld [vmem:[%s2108_s6 + $0xdc] ss:$36 sps:$4 sm:$0xff]   ;;  %v1927_v10 = vld [vmem:[%s2334_s1 + $0x108] sm:$0xff]   ;;  %v1933_v16 = vld [vmem:[%s2108_s6 + $0x10] ss:$36 sps:$4 sm:$0xff]  }
  0x24   : > { %1676 = vmatprep.subr.bf16.mxu1 %v1870_v25  ;;  %v1923_v6 = vld [vmem:[%s2108_s6 + $0xd8] ss:$36 sps:$4 sm:$0xff]   ;;  %v1928_v11 = vld [vmem:[%s2334_s1 + $0x188] sm:$0xff]   ;;  %v1929_v12 = vld [vmem:[%s2334_s1 + $0x140] sm:$0xff]  }
  0x25   : > { %v1930_v13 = vld [vmem:[%s2334_s1 + $0x1c0] sm:$0xff]   ;;  %v1935_v17 = vld [vmem:[%s2108_s6 + $0x14] ss:$36 sps:$4 sm:$0xff]   ;;  %v1957_v33 = vld [vmem:[%s2108_s6 + $0xec] ss:$36 sps:$4 sm:$0xff]  }
  0x26   : > { %1637 = vmatpush3.bf16.msra.mxu0 %v1871_v26  ;;  %v1931_v14 = vld [vmem:[%s2334_s1 + $0x100] sm:$0xff]   ;;  %v1936_v18 = vld [vmem:[%s2108_s6 + $0x18] ss:$36 sps:$4 sm:$0xff]   ;;  %v1940_v21 = vld [vmem:[%s2334_s1 + $0x230] sm:$0xff]  }
  0x27   : > { %1677 = vmatpush3.bf16.msra.mxu1 %v1872_v27  ;;  %1638 = vmatprep.subr.bf16.mxu0 %v1873_v28  ;;  %v1932_v15 = vld [vmem:[%s2334_s1 + $0x180] sm:$0xff]   ;;  %v1939_v20 = vld [vmem:[%s2334_s1 + $0x238] sm:$0xff]   ;;  %v1947_v26 = vld [vmem:[%s2334_s1 + $0x228] sm:$0xff]  }
  0x28   : > { %1678 = vmatprep.subr.bf16.mxu1 %v1874_v29  ;;  %v1938_v19 = vld [vmem:[%s2108_s6 + $0x1c] ss:$36 sps:$4 sm:$0xff]   ;;  %v1943_v23 = vld [vmem:[%s2108_s6 + $0x64] ss:$36 sps:$4 sm:$0xff]   ;;  %v1951_v28 = vld [vmem:[%s2108_s6 + $0xac] ss:$36 sps:$4 sm:$0xff]  }
  0x29   : > { %v1941_v22 = vld [vmem:[%s2108_s6 + $0x5c] ss:$36 sps:$4 sm:$0xff]   ;;  %v1949_v27 = vld [vmem:[%s2108_s6 + $0xa4] ss:$36 sps:$4 sm:$0xff]   ;;  %v1956_v35 = vld [vmem:[%s2334_s1 + $0x210] sm:$0xff]  }
  0x2a   : > { %1639 = vmatpush3.bf16.msra.mxu0 %v1875_v30  ;;  %v1945_v24 = vld [vmem:[%s2108_s6 + $0x58] ss:$36 sps:$4 sm:$0xff]   ;;  %v1946_v25 = vld [vmem:[%s2108_s6 + $0x60] ss:$36 sps:$4 sm:$0xff]  }
  0x2b   : > { %1679 = vmatpush3.bf16.msra.mxu1 %v1876_v31  ;;  %1704 = vmatprep.subr.bf16.mxu0 %v1883_v36  ;;  %v1948_v29 = vld [vmem:[%s2334_s1 + $0x220] sm:$0xff]   ;;  %v1954_v31 = vld [vmem:[%s2108_s6 + $0xa8] ss:$36 sps:$4 sm:$0xff]  }
  0x2c   : > { %1744 = vmatprep.subr.bf16.mxu1 %v1884_v37  ;;  %v1953_v30 = vld [vmem:[%s2108_s6 + $0xa0] ss:$36 sps:$4 sm:$0xff]   ;;  %v1961_v36 = vld [vmem:[%s2108_s6 + $0xe8] ss:$36 sps:$4 sm:$0xff]  }
  0x2d   : > { %1038 = vmatmul.mubr.bf16.vlgmr.msra.gmra.mxu0 %v1877_v32  ;;  %v1955_v32 = vld [vmem:[%s2334_s1 + $0x218] sm:$0xff]   ;;  %v1963_v37 = vld [vmem:[%s2334_s1 + $0x208] sm:$0xff]  }
  0x2e   : > { %1103 = vmatmul.mubr.bf16.vlgmr.msra.gmra.mxu1 %v1880_v34  ;;  %1705 = vmatpush3.bf16.msra.mxu0 %v1885_v38  ;;  %v1959_v34 = vld [vmem:[%s2108_s6 + $0xf4] ss:$36 sps:$4 sm:$0xff]  }
  0x2f   : > { %1745 = vmatpush3.bf16.msra.mxu1 %v1886_v39  ;;  %1706 = vmatprep.subr.bf16.mxu0 %v1887_v40  ;;  %v1962_v38 = vld [vmem:[%s2108_s6 + $0xf0] ss:$36 sps:$4 sm:$0xff]   ;;  %v1965_v39 = vld [vmem:[%s2108_s6 + $0x20] ss:$36 sps:$4 sm:$0xff]  }
  0x30   : > { %1746 = vmatprep.subr.bf16.mxu1 %v1888_v41  ;;  %1045 = vmatprep.mubr.bf16.mxu0 %v1891_v44  ;;  %v1966_v40 = vld [vmem:[%s2108_s6 + $0xb0] ss:$36 sps:$4 sm:$0xff]   ;;  %v1964_v41 = vld [vmem:[%s2334_s1 + $0x200] sm:$0xff]  }
  0x31   : > { %1110 = vmatprep.mubr.bf16.mxu1 %v1893_v45 }
  0x32   : > { %1707 = vmatpush3.bf16.msra.mxu0 %v1889_v42  ;;  %v1967_v42 = vld [vmem:[%s2108_s6 + $0x68] ss:$36 sps:$4 sm:$0xff]  }
  0x33   : > { %1747 = vmatpush3.bf16.msra.mxu1 %v1890_v43  ;;  %1708 = vmatprep.subr.bf16.mxu0 %v1897_v48  ;;  %v1968_v43 = vld [vmem:[%s2108_s6 + $0xf8] ss:$36 sps:$4 sm:$0xff]  }
  0x34   : > { %1748 = vmatprep.subr.bf16.mxu1 %v1898_v49 }
  0x35   : > { %1046 = vmatmul.mubr.bf16.gmra.mxu0 %v1895_v46 }
  0x36   : > { %1111 = vmatmul.mubr.bf16.gmra.mxu1 %v1896_v47  ;;  %1709 = vmatpush3.bf16.msra.mxu0 %v1899_v50 }
  0x37   : > { %1749 = vmatpush3.bf16.msra.mxu1 %v1900_v51  ;;  %1710 = vmatprep.subr.bf16.mxu0 %v1901_v52 }
  0x38   : > { %1750 = vmatprep.subr.bf16.mxu1 %v1902_v53  ;;  %1053 = vmatprep.mubr.bf16.mxu0 %v1905_v56 }
  0x39   : > { %1118 = vmatprep.mubr.bf16.mxu1 %v1907_v57 }
  0x3a   : > { %1711 = vmatpush3.bf16.msra.mxu0 %v1903_v54 }
  0x3b   : > { %1751 = vmatpush3.bf16.msra.mxu1 %v1904_v55  ;;  %1712 = vmatprep.subr.bf16.mxu0 %v1911_v60 }
  0x3c   : > { %1752 = vmatprep.subr.bf16.mxu1 %v1912_v61 }
  0x3d   : > { %1054 = vmatmul.mubr.bf16.gmra.mxu0 %v1909_v58 }
  0x3e   : > { %1119 = vmatmul.mubr.bf16.gmra.mxu1 %v1910_v59  ;;  %1713 = vmatpush3.bf16.msra.mxu0 %v1913_v62 }
  0x3f   : > { %1753 = vmatpush3.bf16.msra.mxu1 %v1914_v63  ;;  %1714 = vmatprep.subr.bf16.mxu0 %v1915_v0 }
  0x40   : > { %1754 = vmatprep.subr.bf16.mxu1 %v1916_v1  ;;  %1061 = vmatprep.mubr.bf16.mxu0 %v1919_v4 }
  0x41   : > { %1126 = vmatprep.mubr.bf16.mxu1 %v1921_v5 }
  0x42   : > { %1715 = vmatpush3.bf16.msra.mxu0 %v1917_v2 }
  0x43   : > { %1755 = vmatpush3.bf16.msra.mxu1 %v1918_v3  ;;  %1716 = vmatprep.subr.bf16.mxu0 %v1925_v8 }
  0x44   : > { %1756 = vmatprep.subr.bf16.mxu1 %v1926_v9 }
  0x45   : > { %1062 = vmatmul.mubr.bf16.gmra.mxu0 %v1923_v6 }
  0x46   : > { %1127 = vmatmul.mubr.bf16.gmra.mxu1 %v1924_v7  ;;  %1717 = vmatpush3.bf16.msra.mxu0 %v1927_v10 }
  0x47   : > { %1757 = vmatpush3.bf16.msra.mxu1 %v1928_v11  ;;  %1718 = vmatprep.subr.bf16.mxu0 %v1929_v12 }
  0x48   : > { %1758 = vmatprep.subr.bf16.mxu1 %v1930_v13  ;;  %1167 = vmatprep.mubr.bf16.mxu0 %v1935_v17 }
  0x49   : > { %1232 = vmatprep.mubr.bf16.mxu1 %v1938_v19 }
  0x4a   : > { %1719 = vmatpush3.bf16.msra.mxu0 %v1931_v14 }
  0x4b   : > { %1759 = vmatpush3.bf16.msra.mxu1 %v1932_v15  ;;  %1796 = vmatprep.subr.bf16.mxu0 %v1939_v20 }
  0x4c   : > { %1820 = vmatprep.subr.bf16.mxu1 %v1939_v20 }
  0x4d   : > { %1168 = vmatmul.mubr.bf16.vlgmr.msra.gmra.mxu0 %v1933_v16 }
  0x4e   : > { %1233 = vmatmul.mubr.bf16.vlgmr.msra.gmra.mxu1 %v1936_v18  ;;  %1797 = vmatpush3.bf16.msra.mxu0 %v1939_v20 }
  0x4f   : > { %1828 = vmatpush3.bf16.msra.mxu1 %v1939_v20  ;;  %1798 = vmatprep.subr.bf16.mxu0 %v1940_v21 }
  0x50   : > { %1821 = vmatprep.subr.bf16.mxu1 %v1940_v21  ;;  %1175 = vmatprep.mubr.bf16.mxu0 %v1941_v22 }
  0x51   : > { %1240 = vmatprep.mubr.bf16.mxu1 %v1943_v23 }
  0x52   : > { %1799 = vmatpush3.bf16.msra.mxu0 %v1940_v21 }
  0x53   : > { %1829 = vmatpush3.bf16.msra.mxu1 %v1940_v21  ;;  %1800 = vmatprep.subr.bf16.mxu0 %v1947_v26 }
  0x54   : > { %1822 = vmatprep.subr.bf16.mxu1 %v1947_v26 }
  0x55   : > { %1176 = vmatmul.mubr.bf16.gmra.mxu0 %v1945_v24 }
  0x56   : > { %1241 = vmatmul.mubr.bf16.gmra.mxu1 %v1946_v25  ;;  %1183 = vmatprep.mubr.bf16.mxu0 %v1949_v27 }
  0x57   : > { %1801 = vmatpush3.bf16.msra.mxu0 %v1947_v26  ;;  %1248 = vmatprep.mubr.bf16.mxu1 %v1951_v28 }
  0x58   : > { %1830 = vmatpush3.bf16.msra.mxu1 %v1947_v26  ;;  %1802 = vmatprep.subr.bf16.mxu0 %v1948_v29 }
  0x59   : > { %1823 = vmatprep.subr.bf16.mxu1 %v1948_v29 }
  0x5b   : > { %1803 = vmatpush3.bf16.msra.mxu0 %v1948_v29 }
  0x5c   : > { %1831 = vmatpush3.bf16.msra.mxu1 %v1948_v29  ;;  %1804 = vmatprep.subr.bf16.mxu0 %v1955_v32 }
  0x5d   : > { %1184 = vmatmul.mubr.bf16.gmra.mxu0 %v1953_v30  ;;  %1824 = vmatprep.subr.bf16.mxu1 %v1955_v32 }
  0x5e   : > { %1249 = vmatmul.mubr.bf16.gmra.mxu1 %v1954_v31  ;;  %1191 = vmatprep.mubr.bf16.mxu0 %v1957_v33 }
  0x5f   : > { %1805 = vmatpush3.bf16.msra.mxu0 %v1955_v32  ;;  %1256 = vmatprep.mubr.bf16.mxu1 %v1959_v34 }
  0x60   : > { %1832 = vmatpush3.bf16.msra.mxu1 %v1955_v32  ;;  %1806 = vmatprep.subr.bf16.mxu0 %v1956_v35 }
  0x61   : > { %1825 = vmatprep.subr.bf16.mxu1 %v1956_v35 }
  0x63   : > { %1807 = vmatpush3.bf16.msra.mxu0 %v1956_v35 }
  0x64   : > { %1833 = vmatpush3.bf16.msra.mxu1 %v1956_v35  ;;  %1808 = vmatprep.subr.bf16.mxu0 %v1963_v37 }
  0x65   : > { %1192 = vmatmul.mubr.bf16.gmra.mxu0 %v1961_v36  ;;  %1826 = vmatprep.subr.bf16.mxu1 %v1963_v37 }
  0x66   : > { %1257 = vmatmul.mubr.bf16.gmra.mxu1 %v1962_v38  ;;  %1812 = vmatprep.mubr.bf16.mxu0 %v1965_v39 }
  0x67   : > { %1809 = vmatpush3.bf16.msra.mxu0 %v1963_v37  ;;  %1816 = vmatprep.mubr.bf16.mxu1 %v1966_v40 }
  0x68   : > { %1834 = vmatpush3.bf16.msra.mxu1 %v1963_v37  ;;  %1810 = vmatprep.subr.bf16.mxu0 %v1964_v41 }
  0x69   : > { %1827 = vmatprep.subr.bf16.mxu1 %v1964_v41 }
  0x6b   : > { %1811 = vmatpush3.bf16.msra.mxu0 %v1964_v41 }
  0x6c   : > { %1835 = vmatpush3.bf16.msra.mxu1 %v1964_v41 }
  0x6e   : > { %1813 = vmatmul.mubr.bf16.vlgmr.msra.gmra.mxu0 %v1967_v42 }
  0x6f   : > { %1817 = vmatmul.mubr.bf16.vlgmr.msra.gmra.mxu1 %v1968_v43 }
  0xed   : > { %v1640_v44 = vpop.f32.mrf.mxu0 }
  0xee   : > { %v1680_v45 = vpop.f32.mrf.mxu1 }
  0xef   : > { %v1641_v46 = vpop.f32.mrf.mxu0 }
  0xf0   : > { %v1681_v47 = vpop.f32.mrf.mxu1  ;;  %v1642_v33 = vadd.f32 %v1641_v46, %v1640_v44 }
  0xf1   : > { %v2272_v48 = vpop.f32.mrf.mxu0  ;;  %v1682_v34 = vadd.f32 %v1681_v47, %v1680_v45 }
  0xf2   : > { %v2274_v49 = vpop.f32.mrf.mxu1 }
  0xf3   : > { %v2276_v50 = vpop.f32.mrf.mxu0 }
  0xf4   : > { %v2278_v51 = vpop.f32.mrf.mxu1 }
  0xf5   : > { %v1646_v52 = vpop.f32.mrf.mxu0 }
  0xf6   : > { %v1686_v53 = vpop.f32.mrf.mxu1 }
  0xf7   : > { %v1647_v54 = vpop.f32.mrf.mxu0 }
  0xf8   : > { %v1687_v55 = vpop.f32.mrf.mxu1  ;;  %v1648_v37 = vadd.f32 %v1647_v54, %v1646_v52  ;;  %v1685_v54 = vadd.f32 %v2278_v51, %v2274_v49 }
  0xf9   : > { %v1649_v56 = vpop.f32.mrf.mxu0  ;;  %v1688_v38 = vadd.f32 %v1687_v55, %v1686_v53  ;;  %v1645_v53 = vadd.f32 %v2276_v50, %v2272_v48 }
  0xfa   : > { %v1689_v57 = vpop.f32.mrf.mxu1 }
  0xfb   : > { %v1650_v58 = vpop.f32.mrf.mxu0  ;;  %v1113_v46 = vadd.f32 %v1688_v38, %v1648_v37 }
  0xfc   : > { %v1690_v59 = vpop.f32.mrf.mxu1  ;;  %v1651_v41 = vadd.f32 %v1650_v58, %v1649_v56 }
  0xfd   : > { %v1652_v60 = vpop.f32.mrf.mxu0  ;;  %v1691_v42 = vadd.f32 %v1690_v59, %v1689_v57 }
  0xfe   : > { %v1692_v61 = vpop.f32.mrf.mxu1 }
  0xff   : > { %v1653_v62 = vpop.f32.mrf.mxu0  ;;  %v1116_v55 = vadd.f32 %v1691_v42, %v1651_v41 }
 0x100   : > { %v1693_v63 = vpop.f32.mrf.mxu1 }
 0x101   : > { %v2280_v0 = vpop.f32.mrf.mxu0 }
 0x102   : > { %v2282_v1 = vpop.f32.mrf.mxu1 }
 0x103   : > { %v2284_v2 = vpop.f32.mrf.mxu0 }
 0x104   : > { %v2286_v3 = vpop.f32.mrf.mxu1 }
 0x105   : > { %2338 = vst [vmem:[#allocation2_spill] sm:$0xff] %v2286_v3  ;;  %v1658_v4 = vpop.f32.mrf.mxu0 }
 0x106   : > { %v1698_v5 = vpop.f32.mrf.mxu1 }
 0x107   : > { %v1659_v6 = vpop.f32.mrf.mxu0 }
 0x108   : > { %v1699_v7 = vpop.f32.mrf.mxu1  ;;  %v1660_v39 = vadd.f32 %v1659_v6, %v1658_v4 }
 0x109   : > { %v1661_v8 = vpop.f32.mrf.mxu0  ;;  %v1700_v40 = vadd.f32 %v1699_v7, %v1698_v5 }
 0x10a   : > { %v1701_v9 = vpop.f32.mrf.mxu1 }
 0x10b   : > { %v1662_v10 = vpop.f32.mrf.mxu0  ;;  %v1129_v47 = vadd.f32 %v1700_v40, %v1660_v39 }
 0x10c   : > { %v1702_v11 = vpop.f32.mrf.mxu1  ;;  %v2346_v4 = vld [vmem:[#allocation2_spill] sm:$0xff] }
 0x10d   : > { %v1720_v12 = vpop.f32.mrf.mxu0  ;;  %v1703_v3 = vadd.f32 %v1702_v11, %v1701_v9  ;;  %v1697_v5 = vadd.f32 %v2346_v4, %v2282_v1 }
 0x10e   : > { %v2288_v13 = vpop.f32.mrf.mxu1 }
 0x10f   : > { %2339 = vst [vmem:[#allocation3_spill] sm:$0xff] %v2288_v13  ;;  %v1721_v14 = vpop.f32.mrf.mxu0  ;;  %v1663_v13 = vadd.f32 %v1662_v10, %v1661_v8  ;;  %v1108_v10 = vadd.f32 %v1685_v54, %v1645_v53 }
 0x110   : > { %v2290_v15 = vpop.f32.mrf.mxu1 }
 0x111   : > { %2340 = vst [vmem:[#allocation4_spill] sm:$0xff] %v2290_v15  ;;  %v1723_v16 = vpop.f32.mrf.mxu0  ;;  %v1105_v15 = vadd.f32 %v1682_v34, %v1642_v33  ;;  %v1132_v6 = vadd.f32 %v1703_v3, %v1663_v13 }
 0x112   : > { %v2292_v17 = vpop.f32.mrf.mxu1 }
 0x113   : > { %2341 = vst [vmem:[#allocation5_spill] sm:$0xff] %v2292_v17  ;;  %v1724_v18 = vpop.f32.mrf.mxu0  ;;  %v1654_v17 = vadd.f32 %v1653_v62, %v1652_v60 }
 0x114   : > { %v2294_v19 = vpop.f32.mrf.mxu1  ;;  %v1725_v49 = vadd.f32 %v1724_v18, %v1723_v16 }
 0x115   : > { %2342 = vst [vmem:[#allocation6_spill] sm:$0xff] %v2294_v19  ;;  %v1726_v20 = vpop.f32.mrf.mxu0 }
 0x116   : > { %v1766_v21 = vpop.f32.mrf.mxu1  ;;  %v1173_v16 = vadd.f32 %v1725_v49, %v1108_v10 }
 0x117   : > { %v1727_v22 = vpop.f32.mrf.mxu0 }
 0x118   : > { %v1767_v23 = vpop.f32.mrf.mxu1 }
 0x119   : > { %v1729_v24 = vpop.f32.mrf.mxu0  ;;  %v1768_v51 = vadd.f32 %v1767_v23, %v1766_v21 }
 0x11a   : > { %v2296_v25 = vpop.f32.mrf.mxu1 }
 0x11b   : > { %2343 = vst [vmem:[#allocation7_spill] sm:$0xff] %v2296_v25  ;;  %v1730_v26 = vpop.f32.mrf.mxu0  ;;  %v1728_v25 = vadd.f32 %v1727_v22, %v1726_v20  ;;  %v2348_v20 = vld [vmem:[#allocation4_spill] sm:$0xff] }
 0x11c   : > { %v2298_v27 = vpop.f32.mrf.mxu1 }
 0x11d   : > { %2344 = vst [vmem:[#allocation8_spill] sm:$0xff] %v2298_v27  ;;  %v1732_v28 = vpop.f32.mrf.mxu0  ;;  %v1694_v27 = vadd.f32 %v1693_v63, %v1692_v61  ;;  %v1178_v60 = vadd.f32 %v1728_v25, %v1113_v46  ;;  %v1731_v61 = vadd.f32 %v1730_v26, %v1729_v24  ;;  %v1657_v63 = vadd.f32 %v2284_v2, %v2280_v0 }
 0x11e   : > { %v1772_v29 = vpop.f32.mrf.mxu1 }
 0x11f   : > { %v1733_v30 = vpop.f32.mrf.mxu0  ;;  %v1121_v59 = vadd.f32 %v1694_v27, %v1654_v17  ;;  %v1181_v0 = vadd.f32 %v1731_v61, %v1116_v55  ;;  %v1243_v24 = vadd.f32 %v1768_v51, %v1178_v60  ;;  %v1124_v1 = vadd.f32 %v1697_v5, %v1657_v63 }
 0x120   : > { %v1773_v31 = vpop.f32.mrf.mxu1  ;;  %v1734_v56 = vadd.f32 %v1733_v30, %v1732_v28 }
 0x121   : > { %v1735_v32 = vpop.f32.mrf.mxu0  ;;  %v1774_v3 = vadd.f32 %v1773_v31, %v1772_v29  ;;  %v2352_v29 = vld [vmem:[#allocation6_spill] sm:$0xff] }
 0x122   : > { %v2300_v35 = vpop.f32.mrf.mxu1  ;;  %v1186_v11 = vadd.f32 %v1734_v56, %v1121_v59  ;;  %v2349_v18 = vld [vmem:[#allocation7_spill] sm:$0xff] }
 0x123   : > { %2345 = vst [vmem:[#allocation9_spill] sm:$0xff] %v2300_v35  ;;  %v1736_v36 = vpop.f32.mrf.mxu0  ;;  %v1722_v35 = vadd.f32 %v1721_v14, %v1720_v12 }
 0x124   : > { %v2302_v43 = vpop.f32.mrf.mxu1  ;;  %v1737_v12 = vadd.f32 %v1736_v36, %v1735_v32  ;;  %v2350_v21 = vld [vmem:[#allocation8_spill] sm:$0xff]  ;;  %v1251_v34 = vadd.f32 %v1774_v3, %v1186_v11  ;;  %v2351_v36 = vld [vmem:[#allocation5_spill] sm:$0xff] }
 0x125   : > { %v1738_v19 = vpop.f32.mrf.mxu0  ;;  %v1170_v8 = vadd.f32 %v1722_v35, %v1105_v15  ;;  %v1581_v15 = vld [vmem:[%s2335_s2] ss:$0 sm:$0xff]  ;;  %v1771_v23 = vadd.f32 %v2350_v21, %v2349_v18  ;;  %v1765_v31 = vadd.f32 %v2352_v29, %v2351_v36 }
 0x126   : > { %v1778_v44 = vpop.f32.mrf.mxu1  ;;  %v1189_v30 = vadd.f32 %v1737_v12, %v1124_v1 }
 0x127   : > { %v1739_v45 = vpop.f32.mrf.mxu0  ;;  %v1246_v40 = vadd.f32 %v1771_v23, %v1181_v0  ;;  %v1238_v55 = vadd.f32 %v1765_v31, %v1173_v16 }
 0x128   : > { %v1740_v52 = vadd.f32 %v1739_v45, %v1738_v19  ;;  %v1779_v57 = vpop.f32.mrf.mxu1  ;;  %v2347_v19 = vld [vmem:[#allocation3_spill] sm:$0xff] }
 0x129   : > { %v1741_v58 = vpop.f32.mrf.mxu0  ;;  %v1780_v7 = vadd.f32 %v1779_v57, %v1778_v44  ;;  %v1762_v22 = vadd.f32 %v2348_v20, %v2347_v19  ;;  %v1582_v44 = vld [vmem:[%s2336_s3] ss:$0 sm:$0xff] }
 0x12a   : > { %v1194_v62 = vadd.f32 %v1740_v52, %v1129_v47  ;;  %v1781_v48 = vpop.f32.mrf.mxu1  ;;  %v2353_v41 = vld [vmem:[#allocation9_spill] sm:$0xff] }
 0x12b   : > { %v1742_v50 = vpop.f32.mrf.mxu0  ;;  %v1235_v28 = vadd.f32 %v1762_v22, %v1170_v8  ;;  %v1777_v42 = vadd.f32 %v2302_v43, %v2353_v41 }
 0x12c   : > { %v1743_v9 = vadd.f32 %v1742_v50, %v1741_v58  ;;  %v1782_v14 = vpop.f32.mrf.mxu1  ;;  %v1259_v17 = vadd.f32 %v1780_v7, %v1194_v62 }
 0x12d   : > { %v1783_v13 = vadd.f32 %v1782_v14, %v1781_v48  ;;  %v1254_v59 = vadd.f32 %v1777_v42, %v1189_v30 }
 0x12e   : > { %v1197_v2 = vadd.f32 %v1743_v9, %v1132_v6  ;;  %v1814_v25 = vpop.f32.mrf.mxu0 }
 0x12f   : > { %v1308_v26 = vadd.f32 %v1814_v25, %v1243_v24  ;;  %v1818_v27 = vpop.f32.mrf.mxu1 }
 0x130   : > { %v1324_v32 = vadd.f32 %v1818_v27, %v1259_v17  ;;  %v1299_v33 = vpop.f32.mrf.mxu0  ;;  %v1262_v35 = vadd.f32 %v1783_v13, %v1197_v2 }
 0x131   : > { %v1339_v37 = vmul.f32 %v1581_v15, %v1308_v26  ;;  %v1300_v38 = vadd.f32 %v1299_v33, %v1235_v28  ;;  %v1315_v39 = vpop.f32.mrf.mxu1 }
 0x132   : > { %v1343_v45 = vmul.f32 %v1581_v15, %v1324_v32  ;;  %v1316_v46 = vadd.f32 %v1315_v39, %v1251_v34  ;;  %v1815_v47 = vpop.f32.mrf.mxu0 }
 0x133   : > { %v1337_v52 = vmul.f32 %v1581_v15, %v1300_v38  ;;  %v1311_v53 = vadd.f32 %v1815_v47, %v1246_v40  ;;  %v1819_v54 = vpop.f32.mrf.mxu1  ;;  %v1354_v60 = vadd.f32 %v1582_v44, %v1339_v37 }
 0x134   : > { %v1341_v56 = vmul.f32 %v1581_v15, %v1316_v46  ;;  %v1327_v57 = vadd.f32 %v1819_v54, %v1262_v35  ;;  %v1302_v58 = vpop.f32.mrf.mxu0  ;;  %v1358_v63 = vadd.f32 %v1582_v44, %v1343_v45 }
 0x135   : > { %v1340_v61 = vmul.f32 %v1581_v15, %v1311_v53  ;;  %v1303_v62 = vadd.f32 %v1302_v58, %v1238_v55  ;;  %v1318_v43 = vpop.f32.mrf.mxu1  ;;  %v1352_v6 = vadd.f32 %v1582_v44, %v1337_v52  ;;  %v1362_v51 = vmax.f32 %v1354_v60, 0.0 }
 0x136   : > { %v1344_v4 = vmul.f32 %v1581_v15, %v1327_v57  ;;  %v1319_v5 = vadd.f32 %v1318_v43, %v1254_v59  ;;  %v1356_v50 = vadd.f32 %v1582_v44, %v1341_v56  ;;  %v1366_v11 = vmax.f32 %v1358_v63, 0.0 }
 0x137   : > { %v1355_v7 = vadd.f32 %v1582_v44, %v1340_v61  ;;  %v1338_v48 = vmul.f32 %v1581_v15, %v1303_v62  ;;  %v1360_v17 = vmax.f32 %v1352_v6, 0.0 }
 0x138   : > { %v1359_v8 = vadd.f32 %v1582_v44, %v1344_v4  ;;  %v1342_v49 = vmul.f32 %v1581_v15, %v1319_v5  ;;  %v1364_v22 = vmax.f32 %v1356_v50, 0.0 }
 0x139   : > { %v1363_v9 = vmax.f32 %v1355_v7, 0.0  ;;  %v1353_v10 = vadd.f32 %v1582_v44, %v1338_v48 }
 0x13a   : > { %v1367_v12 = vmax.f32 %v1359_v8, 0.0  ;;  %v1357_v14 = vadd.f32 %v1582_v44, %v1342_v49 }
 0x13b   : > { %v1609_v19 = vpack.c.bf16 %v1363_v9, %v1362_v51  ;;  %v1361_v20 = vmax.f32 %v1353_v10, 0.0 }
 0x13c   : > { %v1619_v0 = vpack.c.bf16 %v1367_v12, %v1366_v11  ;;  %v1365_v2 = vmax.f32 %v1357_v14, 0.0 }
 0x13d   : > { %1621 = vst [vmem:[%s202_s5 + $0x8] sm:$0xff] %v1609_v19   ;;  %v1604_v24 = vpack.c.bf16 %v1361_v20, %v1360_v17 }
 0x13e   : > { %1623 = vst [vmem:[%s202_s5 + $0x18] sm:$0xff] %v1619_v0   ;;  %v1614_v1 = vpack.c.bf16 %v1365_v2, %v1364_v22 }
 0x13f   : > { %1605 = vst [vmem:[%s202_s5] sm:$0xff] %v1604_v24  }
 0x140   : > { %1622 = vst [vmem:[%s202_s5 + $0x10] sm:$0xff] %v1614_v1  }
 0x141 PF: > { %s14_s15 = sadd.s32 1, %s1975_s15  }
 0x142   : > { %p11_p4 = scmp.ge.s32.totalorder %s14_s15, 4  }
 0x144   :  { %13 = sbr.rel (!%p11_p4) target bundleno = 1 (0x1), region = 66 }

// kernel: _lambda_.7
= control target key start
LH: loop header
LB: loop body
LE: loop exit
PB: predicated region body
PF: predicated region fallthrough
CT: control target
= control target key end

     0   :  { %s1903_s12 = smov 0   ;;  %s2294_s0 = inlined_call_operand.vmem [shape: bf16[128,1152], index: 0, kind: input, shape index: {}]   ;;  %s2295_s1 = inlined_call_operand.vmem [shape: bf16[1152,128], index: 1, kind: input, shape index: {}]   ;;  %s2296_s2 = inlined_call_operand.vmem [shape: f32[128,128], index: 2, kind: input, shape index: {}]   ;;  %s2297_s3 = inlined_call_operand.vmem [shape: f32[128,128], index: 3, kind: output, shape index: {}]  }
   0x1 LB: > { %s1409_s13 = sadd.s32 4294967295, %s1881_s12   ;;  %p1413_p0 = scmp.ge.s32.totalorder %s1881_s12, 1  ;;  %s1881_s12 = sphi %s1903_s12, %s13_s12  }
   0x2   : > { %p150_p1 = scmp.lt.s32.totalorder %s1881_s12, 3 }
   0x4   : > { %p151_p2 = pnand %p1413_p0, %p150_p1 }
   0x6   : > { %154 = sbr.rel (%p151_p2) target bundleno = 313 (0x139), region = 32 }
   0xb   : > { %v1751_v0 = vld [vmem:[%s2295_s1 + $0x78] sm:$0xff]   ;;  %v1755_v4 = vld [vmem:[%s2295_s1 + $0x70] sm:$0xff]   ;;  %v1759_v8 = vld [vmem:[%s2295_s1 + $0x68] sm:$0xff]   ;;  %s1414_s19 = sshll.u32 %s1409_s13, 3 }
   0xc   : > { %v1752_v1 = vld [vmem:[%s2295_s1 + $0xf8] sm:$0xff]   ;;  %1530 = vmatprep.subr.bf16.mxu0 %v1751_v0  ;;  %v1756_v5 = vld [vmem:[%s2295_s1 + $0xf0] sm:$0xff]   ;;  %v1760_v9 = vld [vmem:[%s2295_s1 + $0xe8] sm:$0xff]   ;;  %p181_p3 = scmp.lt.s32.totalorder %s1414_s19, 15 }
   0xd   : > { %v1753_v2 = vld [vmem:[%s2295_s1 + $0x38] sm:$0xff]   ;;  %1570 = vmatprep.subr.bf16.mxu1 %v1752_v1  ;;  %v1757_v6 = vld [vmem:[%s2295_s1 + $0x30] sm:$0xff]   ;;  %v1761_v10 = vld [vmem:[%s2295_s1 + $0x28] sm:$0xff]  }
   0xe   : > { %v1754_v3 = vld [vmem:[%s2295_s1 + $0xb8] sm:$0xff]   ;;  %1531 = vmatpush3.bf16.msra.mxu0 %v1753_v2  ;;  %v1758_v7 = vld [vmem:[%s2295_s1 + $0xb0] sm:$0xff]   ;;  %v1762_v11 = vld [vmem:[%s2295_s1 + $0xa8] sm:$0xff]   ;;  %s2305_s19 = smov (!%p181_p3, %s1414_s19), 15 }
   0xf   : > { %1571 = vmatpush3.bf16.msra.mxu1 %v1754_v3  ;;  %1532 = vmatprep.subr.bf16.mxu0 %v1755_v4  ;;  %v1763_v12 = vld [vmem:[%s2295_s1 + $0x60] sm:$0xff]   ;;  %v1767_v16 = vld [vmem:[%s2295_s1 + $0x58] sm:$0xff]   ;;  %v1771_v20 = vld [vmem:[%s2295_s1 + $0x50] sm:$0xff]   ;;  %s1742_s16 = smul.u32 36, %s2305_s19 }
  0x10   : > { %1572 = vmatprep.subr.bf16.mxu1 %v1756_v5  ;;  %v1764_v13 = vld [vmem:[%s2295_s1 + $0xe0] sm:$0xff]   ;;  %v1768_v17 = vld [vmem:[%s2295_s1 + $0xd8] sm:$0xff]   ;;  %v1772_v21 = vld [vmem:[%s2295_s1 + $0xd0] sm:$0xff]  }
  0x11   : > { %v1765_v14 = vld [vmem:[%s2295_s1 + $0x20] sm:$0xff]   ;;  %v1769_v18 = vld [vmem:[%s2295_s1 + $0x18] sm:$0xff]   ;;  %v1773_v22 = vld [vmem:[%s2295_s1 + $0x10] sm:$0xff]   ;;  %s2009_s13 = scalar_lea.vmem %s2294_s0, %s1742_s16 }
  0x12   : > { %1533 = vmatpush3.bf16.msra.mxu0 %v1757_v6  ;;  %v1766_v15 = vld [vmem:[%s2295_s1 + $0xa0] sm:$0xff]   ;;  %v1770_v19 = vld [vmem:[%s2295_s1 + $0x98] sm:$0xff]   ;;  %v1774_v23 = vld [vmem:[%s2295_s1 + $0x90] sm:$0xff]  }
  0x13   : > { %1573 = vmatpush3.bf16.msra.mxu1 %v1758_v7  ;;  %1534 = vmatprep.subr.bf16.mxu0 %v1759_v8  ;;  %v1775_v24 = vld [vmem:[%s2295_s1 + $0x48] sm:$0xff]   ;;  %v1779_v28 = vld [vmem:[%s2295_s1 + $0x40] sm:$0xff]   ;;  %v1789_v36 = vld [vmem:[%s2295_s1 + $0x178] sm:$0xff]  }
  0x14   : > { %1574 = vmatprep.subr.bf16.mxu1 %v1760_v9  ;;  %v1776_v25 = vld [vmem:[%s2295_s1 + $0xc8] sm:$0xff]   ;;  %v1780_v29 = vld [vmem:[%s2295_s1 + $0xc0] sm:$0xff]   ;;  %v1790_v37 = vld [vmem:[%s2295_s1 + $0x1f8] sm:$0xff]  }
  0x15   : > { %v1777_v26 = vld [vmem:[%s2295_s1 + $0x8] sm:$0xff]   ;;  %v1781_v30 = vld [vmem:[%s2295_s1] sm:$0xff]   ;;  %v1791_v38 = vld [vmem:[%s2295_s1 + $0x138] sm:$0xff]  }
  0x16   : > { %1535 = vmatpush3.bf16.msra.mxu0 %v1761_v10  ;;  %v1778_v27 = vld [vmem:[%s2295_s1 + $0x88] sm:$0xff]   ;;  %v1782_v31 = vld [vmem:[%s2295_s1 + $0x80] sm:$0xff]   ;;  %v1792_v39 = vld [vmem:[%s2295_s1 + $0x1b8] sm:$0xff]  }
  0x17   : > { %1575 = vmatpush3.bf16.msra.mxu1 %v1762_v11  ;;  %1536 = vmatprep.subr.bf16.mxu0 %v1763_v12  ;;  %v1783_v32 = vld [vmem:[%s2009_s13] ss:$36 sps:$4 sm:$0xff]   ;;  %v1786_v34 = vld [vmem:[%s2009_s13 + $0x8] ss:$36 sps:$4 sm:$0xff]   ;;  %v1793_v40 = vld [vmem:[%s2295_s1 + $0x170] sm:$0xff]  }
  0x18   : > { %1576 = vmatprep.subr.bf16.mxu1 %v1764_v13  ;;  %v1785_v33 = vld [vmem:[%s2009_s13 + $0x4] ss:$36 sps:$4 sm:$0xff]   ;;  %v1788_v35 = vld [vmem:[%s2009_s13 + $0xc] ss:$36 sps:$4 sm:$0xff]   ;;  %v1799_v45 = vld [vmem:[%s2009_s13 + $0x54] ss:$36 sps:$4 sm:$0xff]  }
  0x19   : > { %1040 = vmatprep.mubr.bf16.mxu0 %v1785_v33  ;;  %1105 = vmatprep.mubr.bf16.mxu1 %v1788_v35  ;;  %v1794_v41 = vld [vmem:[%s2295_s1 + $0x1f0] sm:$0xff]   ;;  %v1801_v46 = vld [vmem:[%s2009_s13 + $0x48] ss:$36 sps:$4 sm:$0xff]   ;;  %v1807_v52 = vld [vmem:[%s2295_s1 + $0x160] sm:$0xff]  }
  0x1a   : > { %1537 = vmatpush3.bf16.msra.mxu0 %v1765_v14  ;;  %v1795_v42 = vld [vmem:[%s2295_s1 + $0x130] sm:$0xff]   ;;  %v1803_v48 = vld [vmem:[%s2295_s1 + $0x168] sm:$0xff]   ;;  %v1808_v53 = vld [vmem:[%s2295_s1 + $0x1e0] sm:$0xff]  }
  0x1b   : > { %1577 = vmatpush3.bf16.msra.mxu1 %v1766_v15  ;;  %1538 = vmatprep.subr.bf16.mxu0 %v1767_v16  ;;  %v1796_v43 = vld [vmem:[%s2295_s1 + $0x1b0] sm:$0xff]   ;;  %v1804_v49 = vld [vmem:[%s2295_s1 + $0x1e8] sm:$0xff]   ;;  %v1809_v54 = vld [vmem:[%s2295_s1 + $0x120] sm:$0xff]  }
  0x1c   : > { %1578 = vmatprep.subr.bf16.mxu1 %v1768_v17  ;;  %v1797_v44 = vld [vmem:[%s2009_s13 + $0x4c] ss:$36 sps:$4 sm:$0xff]   ;;  %v1810_v55 = vld [vmem:[%s2295_s1 + $0x1a0] sm:$0xff]   ;;  %v1811_v56 = vld [vmem:[%s2009_s13 + $0x94] ss:$36 sps:$4 sm:$0xff]  }
  0x1d   : > { %v1802_v47 = vld [vmem:[%s2009_s13 + $0x50] ss:$36 sps:$4 sm:$0xff]   ;;  %v1805_v50 = vld [vmem:[%s2295_s1 + $0x128] sm:$0xff]   ;;  %v1813_v57 = vld [vmem:[%s2009_s13 + $0x9c] ss:$36 sps:$4 sm:$0xff]  }
  0x1e   : > { %1539 = vmatpush3.bf16.msra.mxu0 %v1769_v18  ;;  %v1806_v51 = vld [vmem:[%s2295_s1 + $0x1a8] sm:$0xff]   ;;  %v1815_v58 = vld [vmem:[%s2009_s13 + $0x90] ss:$36 sps:$4 sm:$0xff]   ;;  %v1816_v59 = vld [vmem:[%s2009_s13 + $0x98] ss:$36 sps:$4 sm:$0xff]  }
  0x1f   : > { %1579 = vmatpush3.bf16.msra.mxu1 %v1770_v19  ;;  %1540 = vmatprep.subr.bf16.mxu0 %v1771_v20  ;;  %v1817_v60 = vld [vmem:[%s2295_s1 + $0x158] sm:$0xff]   ;;  %v1821_v0 = vld [vmem:[%s2295_s1 + $0x150] sm:$0xff]   ;;  %v1827_v5 = vld [vmem:[%s2009_s13 + $0xe4] ss:$36 sps:$4 sm:$0xff]  }
  0x20   : > { %1580 = vmatprep.subr.bf16.mxu1 %v1772_v21  ;;  %v1818_v61 = vld [vmem:[%s2295_s1 + $0x1d8] sm:$0xff]   ;;  %v1822_v1 = vld [vmem:[%s2295_s1 + $0x1d0] sm:$0xff]   ;;  %v1830_v7 = vld [vmem:[%s2009_s13 + $0xe0] ss:$36 sps:$4 sm:$0xff]  }
  0x21   : > { %v1819_v62 = vld [vmem:[%s2295_s1 + $0x118] sm:$0xff]   ;;  %v1823_v2 = vld [vmem:[%s2295_s1 + $0x110] sm:$0xff]   ;;  %v1831_v8 = vld [vmem:[%s2295_s1 + $0x148] sm:$0xff]  }
  0x22   : > { %1541 = vmatpush3.bf16.msra.mxu0 %v1773_v22  ;;  %v1820_v63 = vld [vmem:[%s2295_s1 + $0x198] sm:$0xff]   ;;  %v1824_v3 = vld [vmem:[%s2295_s1 + $0x190] sm:$0xff]   ;;  %v1832_v9 = vld [vmem:[%s2295_s1 + $0x1c8] sm:$0xff]  }
  0x23   : > { %1581 = vmatpush3.bf16.msra.mxu1 %v1774_v23  ;;  %1542 = vmatprep.subr.bf16.mxu0 %v1775_v24  ;;  %v1825_v4 = vld [vmem:[%s2009_s13 + $0xdc] ss:$36 sps:$4 sm:$0xff]   ;;  %v1833_v10 = vld [vmem:[%s2295_s1 + $0x108] sm:$0xff]   ;;  %v1839_v16 = vld [vmem:[%s2009_s13 + $0x10] ss:$36 sps:$4 sm:$0xff]  }
  0x24   : > { %1582 = vmatprep.subr.bf16.mxu1 %v1776_v25  ;;  %v1829_v6 = vld [vmem:[%s2009_s13 + $0xd8] ss:$36 sps:$4 sm:$0xff]   ;;  %v1834_v11 = vld [vmem:[%s2295_s1 + $0x188] sm:$0xff]   ;;  %v1835_v12 = vld [vmem:[%s2295_s1 + $0x140] sm:$0xff]  }
  0x25   : > { %v1836_v13 = vld [vmem:[%s2295_s1 + $0x1c0] sm:$0xff]   ;;  %v1841_v17 = vld [vmem:[%s2009_s13 + $0x14] ss:$36 sps:$4 sm:$0xff]   ;;  %v1863_v33 = vld [vmem:[%s2009_s13 + $0xec] ss:$36 sps:$4 sm:$0xff]  }
  0x26   : > { %1543 = vmatpush3.bf16.msra.mxu0 %v1777_v26  ;;  %v1837_v14 = vld [vmem:[%s2295_s1 + $0x100] sm:$0xff]   ;;  %v1842_v18 = vld [vmem:[%s2009_s13 + $0x18] ss:$36 sps:$4 sm:$0xff]   ;;  %v1846_v21 = vld [vmem:[%s2295_s1 + $0x230] sm:$0xff]  }
  0x27   : > { %1583 = vmatpush3.bf16.msra.mxu1 %v1778_v27  ;;  %1544 = vmatprep.subr.bf16.mxu0 %v1779_v28  ;;  %v1838_v15 = vld [vmem:[%s2295_s1 + $0x180] sm:$0xff]   ;;  %v1845_v20 = vld [vmem:[%s2295_s1 + $0x238] sm:$0xff]   ;;  %v1853_v26 = vld [vmem:[%s2295_s1 + $0x228] sm:$0xff]  }
  0x28   : > { %1584 = vmatprep.subr.bf16.mxu1 %v1780_v29  ;;  %v1844_v19 = vld [vmem:[%s2009_s13 + $0x1c] ss:$36 sps:$4 sm:$0xff]   ;;  %v1849_v23 = vld [vmem:[%s2009_s13 + $0x64] ss:$36 sps:$4 sm:$0xff]   ;;  %v1857_v28 = vld [vmem:[%s2009_s13 + $0xac] ss:$36 sps:$4 sm:$0xff]  }
  0x29   : > { %v1847_v22 = vld [vmem:[%s2009_s13 + $0x5c] ss:$36 sps:$4 sm:$0xff]   ;;  %v1855_v27 = vld [vmem:[%s2009_s13 + $0xa4] ss:$36 sps:$4 sm:$0xff]   ;;  %v1862_v35 = vld [vmem:[%s2295_s1 + $0x210] sm:$0xff]  }
  0x2a   : > { %1545 = vmatpush3.bf16.msra.mxu0 %v1781_v30  ;;  %v1851_v24 = vld [vmem:[%s2009_s13 + $0x58] ss:$36 sps:$4 sm:$0xff]   ;;  %v1852_v25 = vld [vmem:[%s2009_s13 + $0x60] ss:$36 sps:$4 sm:$0xff]  }
  0x2b   : > { %1585 = vmatpush3.bf16.msra.mxu1 %v1782_v31  ;;  %1610 = vmatprep.subr.bf16.mxu0 %v1789_v36  ;;  %v1854_v29 = vld [vmem:[%s2295_s1 + $0x220] sm:$0xff]   ;;  %v1860_v31 = vld [vmem:[%s2009_s13 + $0xa8] ss:$36 sps:$4 sm:$0xff]  }
  0x2c   : > { %1650 = vmatprep.subr.bf16.mxu1 %v1790_v37  ;;  %v1859_v30 = vld [vmem:[%s2009_s13 + $0xa0] ss:$36 sps:$4 sm:$0xff]   ;;  %v1867_v36 = vld [vmem:[%s2009_s13 + $0xe8] ss:$36 sps:$4 sm:$0xff]  }
  0x2d   : > { %1041 = vmatmul.mubr.bf16.vlgmr.msra.gmra.mxu0 %v1783_v32  ;;  %v1861_v32 = vld [vmem:[%s2295_s1 + $0x218] sm:$0xff]   ;;  %v1869_v37 = vld [vmem:[%s2295_s1 + $0x208] sm:$0xff]  }
  0x2e   : > { %1106 = vmatmul.mubr.bf16.vlgmr.msra.gmra.mxu1 %v1786_v34  ;;  %1611 = vmatpush3.bf16.msra.mxu0 %v1791_v38  ;;  %v1865_v34 = vld [vmem:[%s2009_s13 + $0xf4] ss:$36 sps:$4 sm:$0xff]  }
  0x2f   : > { %1651 = vmatpush3.bf16.msra.mxu1 %v1792_v39  ;;  %1612 = vmatprep.subr.bf16.mxu0 %v1793_v40  ;;  %v1868_v38 = vld [vmem:[%s2009_s13 + $0xf0] ss:$36 sps:$4 sm:$0xff]   ;;  %v1871_v39 = vld [vmem:[%s2009_s13 + $0x20] ss:$36 sps:$4 sm:$0xff]  }
  0x30   : > { %1652 = vmatprep.subr.bf16.mxu1 %v1794_v41  ;;  %1048 = vmatprep.mubr.bf16.mxu0 %v1797_v44  ;;  %v1872_v40 = vld [vmem:[%s2009_s13 + $0xb0] ss:$36 sps:$4 sm:$0xff]   ;;  %v1870_v41 = vld [vmem:[%s2295_s1 + $0x200] sm:$0xff]  }
  0x31   : > { %1113 = vmatprep.mubr.bf16.mxu1 %v1799_v45 }
  0x32   : > { %1613 = vmatpush3.bf16.msra.mxu0 %v1795_v42  ;;  %v1873_v42 = vld [vmem:[%s2009_s13 + $0x68] ss:$36 sps:$4 sm:$0xff]  }
  0x33   : > { %1653 = vmatpush3.bf16.msra.mxu1 %v1796_v43  ;;  %1614 = vmatprep.subr.bf16.mxu0 %v1803_v48  ;;  %v1874_v43 = vld [vmem:[%s2009_s13 + $0xf8] ss:$36 sps:$4 sm:$0xff]   ;;  %s1417_s13 = sshll.u32 %s2305_s19, 3 }
  0x34   : > { %1654 = vmatprep.subr.bf16.mxu1 %v1804_v49  ;;  %s2225_s17 = scalar_lea.vmem %s2296_s2, %s1417_s13  ;;  %s2275_s21 = scalar_lea.vmem %s2297_s3, %s1417_s13 }
  0x35   : > { %1049 = vmatmul.mubr.bf16.gmra.mxu0 %v1801_v46 }
  0x36   : > { %1114 = vmatmul.mubr.bf16.gmra.mxu1 %v1802_v47  ;;  %1615 = vmatpush3.bf16.msra.mxu0 %v1805_v50 }
  0x37   : > { %1655 = vmatpush3.bf16.msra.mxu1 %v1806_v51  ;;  %1616 = vmatprep.subr.bf16.mxu0 %v1807_v52 }
  0x38   : > { %1656 = vmatprep.subr.bf16.mxu1 %v1808_v53  ;;  %1056 = vmatprep.mubr.bf16.mxu0 %v1811_v56 }
  0x39   : > { %1121 = vmatprep.mubr.bf16.mxu1 %v1813_v57 }
  0x3a   : > { %1617 = vmatpush3.bf16.msra.mxu0 %v1809_v54 }
  0x3b   : > { %1657 = vmatpush3.bf16.msra.mxu1 %v1810_v55  ;;  %1618 = vmatprep.subr.bf16.mxu0 %v1817_v60 }
  0x3c   : > { %1658 = vmatprep.subr.bf16.mxu1 %v1818_v61 }
  0x3d   : > { %1057 = vmatmul.mubr.bf16.gmra.mxu0 %v1815_v58 }
  0x3e   : > { %1122 = vmatmul.mubr.bf16.gmra.mxu1 %v1816_v59  ;;  %1619 = vmatpush3.bf16.msra.mxu0 %v1819_v62 }
  0x3f   : > { %1659 = vmatpush3.bf16.msra.mxu1 %v1820_v63  ;;  %1620 = vmatprep.subr.bf16.mxu0 %v1821_v0 }
  0x40   : > { %1660 = vmatprep.subr.bf16.mxu1 %v1822_v1  ;;  %1064 = vmatprep.mubr.bf16.mxu0 %v1825_v4 }
  0x41   : > { %1129 = vmatprep.mubr.bf16.mxu1 %v1827_v5 }
  0x42   : > { %1621 = vmatpush3.bf16.msra.mxu0 %v1823_v2 }
  0x43   : > { %1661 = vmatpush3.bf16.msra.mxu1 %v1824_v3  ;;  %1622 = vmatprep.subr.bf16.mxu0 %v1831_v8 }
  0x44   : > { %1662 = vmatprep.subr.bf16.mxu1 %v1832_v9 }
  0x45   : > { %1065 = vmatmul.mubr.bf16.gmra.mxu0 %v1829_v6 }
  0x46   : > { %1130 = vmatmul.mubr.bf16.gmra.mxu1 %v1830_v7  ;;  %1623 = vmatpush3.bf16.msra.mxu0 %v1833_v10 }
  0x47   : > { %1663 = vmatpush3.bf16.msra.mxu1 %v1834_v11  ;;  %1624 = vmatprep.subr.bf16.mxu0 %v1835_v12 }
  0x48   : > { %1664 = vmatprep.subr.bf16.mxu1 %v1836_v13  ;;  %1170 = vmatprep.mubr.bf16.mxu0 %v1841_v17 }
  0x49   : > { %1235 = vmatprep.mubr.bf16.mxu1 %v1844_v19 }
  0x4a   : > { %1625 = vmatpush3.bf16.msra.mxu0 %v1837_v14 }
  0x4b   : > { %1665 = vmatpush3.bf16.msra.mxu1 %v1838_v15  ;;  %1702 = vmatprep.subr.bf16.mxu0 %v1845_v20 }
  0x4c   : > { %1726 = vmatprep.subr.bf16.mxu1 %v1845_v20 }
  0x4d   : > { %1171 = vmatmul.mubr.bf16.vlgmr.msra.gmra.mxu0 %v1839_v16 }
  0x4e   : > { %1236 = vmatmul.mubr.bf16.vlgmr.msra.gmra.mxu1 %v1842_v18  ;;  %1703 = vmatpush3.bf16.msra.mxu0 %v1845_v20 }
  0x4f   : > { %1734 = vmatpush3.bf16.msra.mxu1 %v1845_v20  ;;  %1704 = vmatprep.subr.bf16.mxu0 %v1846_v21 }
  0x50   : > { %1727 = vmatprep.subr.bf16.mxu1 %v1846_v21  ;;  %1178 = vmatprep.mubr.bf16.mxu0 %v1847_v22 }
  0x51   : > { %1243 = vmatprep.mubr.bf16.mxu1 %v1849_v23 }
  0x52   : > { %1705 = vmatpush3.bf16.msra.mxu0 %v1846_v21 }
  0x53   : > { %1735 = vmatpush3.bf16.msra.mxu1 %v1846_v21  ;;  %1706 = vmatprep.subr.bf16.mxu0 %v1853_v26 }
  0x54   : > { %1728 = vmatprep.subr.bf16.mxu1 %v1853_v26 }
  0x55   : > { %1179 = vmatmul.mubr.bf16.gmra.mxu0 %v1851_v24 }
  0x56   : > { %1244 = vmatmul.mubr.bf16.gmra.mxu1 %v1852_v25  ;;  %1186 = vmatprep.mubr.bf16.mxu0 %v1855_v27 }
  0x57   : > { %1707 = vmatpush3.bf16.msra.mxu0 %v1853_v26  ;;  %1251 = vmatprep.mubr.bf16.mxu1 %v1857_v28 }
  0x58   : > { %1736 = vmatpush3.bf16.msra.mxu1 %v1853_v26  ;;  %1708 = vmatprep.subr.bf16.mxu0 %v1854_v29 }
  0x59   : > { %1729 = vmatprep.subr.bf16.mxu1 %v1854_v29 }
  0x5b   : > { %1709 = vmatpush3.bf16.msra.mxu0 %v1854_v29 }
  0x5c   : > { %1737 = vmatpush3.bf16.msra.mxu1 %v1854_v29  ;;  %1710 = vmatprep.subr.bf16.mxu0 %v1861_v32 }
  0x5d   : > { %1187 = vmatmul.mubr.bf16.gmra.mxu0 %v1859_v30  ;;  %1730 = vmatprep.subr.bf16.mxu1 %v1861_v32  ;;  %v384_v30 = vld [vmem:[%s2225_s17] sm:$0xff] }
  0x5e   : > { %1252 = vmatmul.mubr.bf16.gmra.mxu1 %v1860_v31  ;;  %1194 = vmatprep.mubr.bf16.mxu0 %v1863_v33 }
  0x5f   : > { %1711 = vmatpush3.bf16.msra.mxu0 %v1861_v32  ;;  %1259 = vmatprep.mubr.bf16.mxu1 %v1865_v34  ;;  %v386_v34 = vld [vmem:[%s2225_s17 + $0x10] sm:$0xff] }
  0x60   : > { %1738 = vmatpush3.bf16.msra.mxu1 %v1861_v32  ;;  %1712 = vmatprep.subr.bf16.mxu0 %v1862_v35 }
  0x61   : > { %1731 = vmatprep.subr.bf16.mxu1 %v1862_v35 }
  0x63   : > { %1713 = vmatpush3.bf16.msra.mxu0 %v1862_v35 }
  0x64   : > { %1739 = vmatpush3.bf16.msra.mxu1 %v1862_v35  ;;  %1714 = vmatprep.subr.bf16.mxu0 %v1869_v37 }
  0x65   : > { %1195 = vmatmul.mubr.bf16.gmra.mxu0 %v1867_v36  ;;  %1732 = vmatprep.subr.bf16.mxu1 %v1869_v37 }
  0x66   : > { %1260 = vmatmul.mubr.bf16.gmra.mxu1 %v1868_v38  ;;  %1718 = vmatprep.mubr.bf16.mxu0 %v1871_v39  ;;  %v390_v38 = vld [vmem:[%s2225_s17 + $0x30] sm:$0xff] }
  0x67   : > { %1715 = vmatpush3.bf16.msra.mxu0 %v1869_v37  ;;  %1722 = vmatprep.mubr.bf16.mxu1 %v1872_v40 }
  0x68   : > { %1740 = vmatpush3.bf16.msra.mxu1 %v1869_v37  ;;  %1716 = vmatprep.subr.bf16.mxu0 %v1870_v41 }
  0x69   : > { %1733 = vmatprep.subr.bf16.mxu1 %v1870_v41 }
  0x6b   : > { %1717 = vmatpush3.bf16.msra.mxu0 %v1870_v41 }
  0x6c   : > { %1741 = vmatpush3.bf16.msra.mxu1 %v1870_v41  ;;  %v385_v41 = vld [vmem:[%s2225_s17 + $0x8] sm:$0xff] }
  0x6e   : > { %1719 = vmatmul.mubr.bf16.vlgmr.msra.gmra.mxu0 %v1873_v42 }
  0x6f   : > { %1723 = vmatmul.mubr.bf16.vlgmr.msra.gmra.mxu1 %v1874_v43 }
  0xed   : > { %v1546_v44 = vpop.f32.mrf.mxu0 }
  0xee   : > { %v2173_v45 = vpop.f32.mrf.mxu1 }
  0xef   : > { %v1547_v46 = vpop.f32.mrf.mxu0 }
  0xf0   : > { %v1587_v47 = vpop.f32.mrf.mxu1  ;;  %v1548_v27 = vadd.f32 %v1547_v46, %v1546_v44  ;;  %v387_v46 = vld [vmem:[%s2225_s17 + $0x18] sm:$0xff] }
  0xf1   : > { %v1549_v48 = vpop.f32.mrf.mxu0  ;;  %v1588_v43 = vadd.f32 %v1587_v47, %v2173_v45 }
  0xf2   : > { %v2175_v49 = vpop.f32.mrf.mxu1  ;;  %v1043_v36 = vadd.f32 %v1548_v27, %v384_v30 }
  0xf3   : > { %v1550_v50 = vpop.f32.mrf.mxu0 }
  0xf4   : > { %v2177_v51 = vpop.f32.mrf.mxu1  ;;  %v1551_v37 = vadd.f32 %v1550_v50, %v1549_v48  ;;  %v1108_v27 = vadd.f32 %v1588_v43, %v1043_v36 }
  0xf5   : > { %v1552_v52 = vpop.f32.mrf.mxu0  ;;  %v1591_v45 = vadd.f32 %v2177_v51, %v2175_v49 }
  0xf6   : > { %v2179_v53 = vpop.f32.mrf.mxu1  ;;  %v1046_v48 = vadd.f32 %v1551_v37, %v385_v41 }
  0xf7   : > { %v1553_v54 = vpop.f32.mrf.mxu0 }
  0xf8   : > { %v2181_v55 = vpop.f32.mrf.mxu1  ;;  %v1554_v31 = vadd.f32 %v1553_v54, %v1552_v52  ;;  %v1111_v41 = vadd.f32 %v1591_v45, %v1046_v48 }
  0xf9   : > { %v1555_v56 = vpop.f32.mrf.mxu0  ;;  %v1594_v50 = vadd.f32 %v2181_v55, %v2179_v53  ;;  %v389_v55 = vld [vmem:[%s2225_s17 + $0x28] sm:$0xff] }
  0xfa   : > { %v2183_v57 = vpop.f32.mrf.mxu1  ;;  %v1051_v44 = vadd.f32 %v1554_v31, %v386_v34 }
  0xfb   : > { %v1556_v58 = vpop.f32.mrf.mxu0 }
  0xfc   : > { %v2185_v59 = vpop.f32.mrf.mxu1  ;;  %v1557_v42 = vadd.f32 %v1556_v58, %v1555_v56 }
  0xfd   : > { %v1558_v60 = vpop.f32.mrf.mxu0  ;;  %v1597_v53 = vadd.f32 %v2185_v59, %v2183_v57 }
  0xfe   : > { %v2187_v61 = vpop.f32.mrf.mxu1  ;;  %v1054_v47 = vadd.f32 %v1557_v42, %v387_v46 }
  0xff   : > { %v1559_v62 = vpop.f32.mrf.mxu0 }
 0x100   : > { %v2189_v63 = vpop.f32.mrf.mxu1  ;;  %v1560_v52 = vadd.f32 %v1559_v62, %v1558_v60  ;;  %v1116_v62 = vadd.f32 %v1594_v50, %v1051_v44 }
 0x101   : > { %v2191_v0 = vpop.f32.mrf.mxu0  ;;  %v1600_v49 = vadd.f32 %v2189_v63, %v2187_v61 }
 0x102   : > { %v2193_v1 = vpop.f32.mrf.mxu1 }
 0x103   : > { %v2195_v2 = vpop.f32.mrf.mxu0 }
 0x104   : > { %v2197_v3 = vpop.f32.mrf.mxu1 }
 0x105   : > { %v1564_v4 = vpop.f32.mrf.mxu0 }
 0x106   : > { %v1604_v5 = vpop.f32.mrf.mxu1 }
 0x107   : > { %v1565_v6 = vpop.f32.mrf.mxu0 }
 0x108   : > { %v1605_v7 = vpop.f32.mrf.mxu1  ;;  %v1566_v35 = vadd.f32 %v1565_v6, %v1564_v4  ;;  %v391_v6 = vld [vmem:[%s2225_s17 + $0x38] sm:$0xff] }
 0x109   : > { %v1567_v8 = vpop.f32.mrf.mxu0  ;;  %v1606_v58 = vadd.f32 %v1605_v7, %v1604_v5 }
 0x10a   : > { %v2199_v9 = vpop.f32.mrf.mxu1  ;;  %v1067_v4 = vadd.f32 %v1566_v35, %v390_v38 }
 0x10b   : > { %v1568_v10 = vpop.f32.mrf.mxu0 }
 0x10c   : > { %v2201_v11 = vpop.f32.mrf.mxu1  ;;  %v1569_v54 = vadd.f32 %v1568_v10, %v1567_v8  ;;  %v1563_v10 = vadd.f32 %v2195_v2, %v2191_v0  ;;  %v1132_v36 = vadd.f32 %v1606_v58, %v1067_v4  ;;  %v1119_v2 = vadd.f32 %v1597_v53, %v1054_v47 }
 0x10d   : > { %v1626_v12 = vpop.f32.mrf.mxu0  ;;  %v1609_v51 = vadd.f32 %v2201_v11, %v2199_v9  ;;  %v1603_v11 = vadd.f32 %v2197_v3, %v2193_v1 }
 0x10e   : > { %v2203_v13 = vpop.f32.mrf.mxu1  ;;  %v1070_v31 = vadd.f32 %v1569_v54, %v391_v6  ;;  %v1062_v57 = vadd.f32 %v1563_v10, %v389_v55 }
 0x10f   : > { %v1627_v14 = vpop.f32.mrf.mxu0 }
 0x110   : > { %v2205_v15 = vpop.f32.mrf.mxu1  ;;  %v1628_v37 = vadd.f32 %v1627_v14, %v1626_v12  ;;  %v1135_v59 = vadd.f32 %v1609_v51, %v1070_v31  ;;  %v1127_v6 = vadd.f32 %v1603_v11, %v1062_v57 }
 0x111   : > { %v2207_v16 = vpop.f32.mrf.mxu0  ;;  %v1668_v46 = vadd.f32 %v2205_v15, %v2203_v13 }
 0x112   : > { %v2209_v17 = vpop.f32.mrf.mxu1  ;;  %v1173_v44 = vadd.f32 %v1628_v37, %v1108_v27 }
 0x113   : > { %2298 = vst [vmem:[#allocation2_spill] sm:$0xff] %v2209_v17  ;;  %v2211_v18 = vpop.f32.mrf.mxu0 }
 0x114   : > { %v2213_v19 = vpop.f32.mrf.mxu1  ;;  %v1631_v61 = vadd.f32 %v2211_v18, %v2207_v16 }
 0x115   : > { %2299 = vst [vmem:[#allocation3_spill] sm:$0xff] %v2213_v19  ;;  %v1632_v20 = vpop.f32.mrf.mxu0 }
 0x116   : > { %v2215_v21 = vpop.f32.mrf.mxu1  ;;  %v1176_v3 = vadd.f32 %v1631_v61, %v1111_v41 }
 0x117   : > { %v1633_v22 = vpop.f32.mrf.mxu0 }
 0x118   : > { %v2218_v23 = vpop.f32.mrf.mxu1  ;;  %v1634_v60 = vadd.f32 %v1633_v22, %v1632_v20 }
 0x119   : > { %v1635_v24 = vpop.f32.mrf.mxu0  ;;  %v1674_v63 = vadd.f32 %v2218_v23, %v2215_v21  ;;  %v1238_v23 = vadd.f32 %v1668_v46, %v1173_v44 }
 0x11a   : > { %v2227_v25 = vpop.f32.mrf.mxu1  ;;  %v1181_v20 = vadd.f32 %v1634_v60, %v1116_v62  ;;  %v2302_v50 = vld [vmem:[#allocation2_spill] sm:$0xff] }
 0x11b   : > { %v1636_v26 = vpop.f32.mrf.mxu0 }
 0x11c   : > { %v2229_v28 = vpop.f32.mrf.mxu1  ;;  %v1637_v22 = vadd.f32 %v1636_v26, %v1635_v24  ;;  %v1246_v4 = vadd.f32 %v1674_v63, %v1181_v20 }
 0x11d   : > { %2300 = vst [vmem:[#allocation4_spill] sm:$0xff] %v2229_v28  ;;  %v1638_v29 = vpop.f32.mrf.mxu0  ;;  %v388_v28 = vld [vmem:[%s2225_s17 + $0x20] sm:$0xff] }
 0x11e   : > { %v2232_v32 = vpop.f32.mrf.mxu1  ;;  %v1059_v8 = vadd.f32 %v1560_v52, %v388_v28  ;;  %v1184_v52 = vadd.f32 %v1637_v22, %v1119_v2 }
 0x11f   : > { %v1639_v33 = vpop.f32.mrf.mxu0 }
 0x120   : > { %v2236_v39 = vpop.f32.mrf.mxu1  ;;  %v1640_v5 = vadd.f32 %v1639_v33, %v1638_v29  ;;  %v1124_v42 = vadd.f32 %v1600_v49, %v1059_v8 }
 0x121   : > { %v1641_v40 = vpop.f32.mrf.mxu0  ;;  %v1680_v16 = vadd.f32 %v2236_v39, %v2232_v32 }
 0x122   : > { %v2241_v19 = vpop.f32.mrf.mxu1  ;;  %v1189_v24 = vadd.f32 %v1640_v5, %v1124_v42 }
 0x123   : > { %v1642_v17 = vpop.f32.mrf.mxu0 }
 0x124   : > { %v2247_v30 = vpop.f32.mrf.mxu1  ;;  %v1643_v26 = vadd.f32 %v1642_v17, %v1641_v40  ;;  %v2301_v17 = vld [vmem:[#allocation4_spill] sm:$0xff]  ;;  %v1254_v27 = vadd.f32 %v1680_v16, %v1189_v24 }
 0x125   : > { %v1644_v56 = vpop.f32.mrf.mxu0  ;;  %v1677_v13 = vadd.f32 %v2301_v17, %v2227_v25  ;;  %v1683_v25 = vadd.f32 %v2247_v30, %v2241_v19 }
 0x126   : > { %v1684_v34 = vpop.f32.mrf.mxu1  ;;  %v1192_v40 = vadd.f32 %v1643_v26, %v1127_v6 }
 0x127   : > { %v1645_v35 = vpop.f32.mrf.mxu0  ;;  %v1249_v60 = vadd.f32 %v1677_v13, %v1184_v52 }
 0x128   : > { %v1646_v38 = vadd.f32 %v1645_v35, %v1644_v56  ;;  %v1685_v7 = vpop.f32.mrf.mxu1  ;;  %v2303_v56 = vld [vmem:[#allocation3_spill] sm:$0xff]  ;;  %v1257_v55 = vadd.f32 %v1683_v25, %v1192_v40 }
 0x129   : > { %v1647_v0 = vpop.f32.mrf.mxu0  ;;  %v1686_v43 = vadd.f32 %v1685_v7, %v1684_v34  ;;  %v1671_v45 = vadd.f32 %v2303_v56, %v2302_v50 }
 0x12a   : > { %v1197_v28 = vadd.f32 %v1646_v38, %v1132_v36  ;;  %v1687_v12 = vpop.f32.mrf.mxu1 }
 0x12b   : > { %v1648_v14 = vpop.f32.mrf.mxu0  ;;  %v1241_v34 = vadd.f32 %v1671_v45, %v1176_v3 }
 0x12c   : > { %v1649_v9 = vadd.f32 %v1648_v14, %v1647_v0  ;;  %v1688_v29 = vpop.f32.mrf.mxu1  ;;  %v1262_v33 = vadd.f32 %v1686_v43, %v1197_v28 }
 0x12d   : > { %v1689_v18 = vadd.f32 %v1688_v29, %v1687_v12 }
 0x12e   : > { %v1200_v54 = vadd.f32 %v1649_v9, %v1135_v59  ;;  %v1720_v1 = vpop.f32.mrf.mxu0 }
 0x12f   : > { %v1311_v15 = vadd.f32 %v1720_v1, %v1246_v4  ;;  %v1724_v21 = vpop.f32.mrf.mxu1 }
 0x130   : > { %v1327_v32 = vadd.f32 %v1724_v21, %v1262_v33  ;;  %v1302_v39 = vpop.f32.mrf.mxu0  ;;  %v1265_v48 = vadd.f32 %v1689_v18, %v1200_v54 }
 0x131   : > { %1335 = vst [vmem:[%s2275_s21 + $0x10] sm:$0xff] %v1311_v15  ;;  %v1303_v47 = vadd.f32 %v1302_v39, %v1238_v23  ;;  %v1318_v58 = vpop.f32.mrf.mxu1 }
 0x132   : > { %1339 = vst [vmem:[%s2275_s21 + $0x30] sm:$0xff] %v1327_v32  ;;  %v1319_v62 = vadd.f32 %v1318_v58, %v1254_v27  ;;  %v1721_v8 = vpop.f32.mrf.mxu0 }
 0x133   : > { %1333 = vst [vmem:[%s2275_s21] sm:$0xff] %v1303_v47  ;;  %v1314_v10 = vadd.f32 %v1721_v8, %v1249_v60  ;;  %v1725_v31 = vpop.f32.mrf.mxu1 }
 0x134   : > { %1337 = vst [vmem:[%s2275_s21 + $0x20] sm:$0xff] %v1319_v62  ;;  %v1330_v35 = vadd.f32 %v1725_v31, %v1265_v48  ;;  %v1305_v53 = vpop.f32.mrf.mxu0 }
 0x135   : > { %1336 = vst [vmem:[%s2275_s21 + $0x18] sm:$0xff] %v1314_v10  ;;  %v1306_v36 = vadd.f32 %v1305_v53, %v1241_v34  ;;  %v1321_v37 = vpop.f32.mrf.mxu1 }
 0x136   : > { %1340 = vst [vmem:[%s2275_s21 + $0x38] sm:$0xff] %v1330_v35  ;;  %v1322_v38 = vadd.f32 %v1321_v37, %v1257_v55 }
 0x137   : > { %1334 = vst [vmem:[%s2275_s21 + $0x8] sm:$0xff] %v1306_v36 }
 0x138   : > { %1338 = vst [vmem:[%s2275_s21 + $0x28] sm:$0xff] %v1322_v38 }
 0x139 PF: > { %s13_s12 = sadd.s32 1, %s1881_s12  }
 0x13a   : > { %p10_p4 = scmp.ge.s32.totalorder %s13_s12, 4  }
 0x13c   :  { %12 = sbr.rel (!%p10_p4) target bundleno = 1 (0x1), region = 65 }

</bundles_post_ra>
